<compile_context>
chip_gen: v5e
topology: v5e:2x2
jax: 0.10.0
libtpu: 0.0.40
codegen_flags: <defaults>
</compile_context>

<pallas_src>
import functools

import jax
import jax.numpy as jnp
from jax import lax
from jax.experimental import pallas as pl
from jax.experimental.pallas import tpu as pltpu

PATCH = 14          # ViT patch size used by both CLIP-ViT-L/14 and DINOv2/14
CLIP_DIM = 1024     # CLIP ViT-L patch-token dim (reference reshapes to 1024)
DINO_DIM = 1536     # DINOv2 ViT-g patch-token dim (reference reshapes to 1536)
OUT_LAYERS = 4      # len(self.out_layers) == 4; forward uses layers i % 2 == 1


def _round_up(x, m):
    return ((x + m - 1) // m) * m


# ----------------------------------------------------------------------------
# Pallas kernel: fused max cosine-similarity retrieval.
#   grid = (split, L, per_split_M // tile_m)
#   (split, L) are parallel; the memory axis is the reduction ("arbitrary")
#   axis with the running max kept directly in the VMEM-resident output block.
#   Operands are pre-normalized outside, so the body is a pure bf16 MXU dot
#   followed by elementwise (VPU) maxes into an (8, B*N) accumulator.
# ----------------------------------------------------------------------------
def _fused_max_cossim_kernel(q_ref, bank_ref, o_ref, *, chunk):
    """q_ref: (D, BN) bf16, bank_ref: (tile_m, D) bf16, o_ref: (8, BN) f32."""
    j = pl.program_id(2)

    @pl.when(j == 0)
    def _():
        o_ref[...] = jnp.full(o_ref.shape, -jnp.inf, o_ref.dtype)

    q = q_ref[...]                      # (D, BN) bf16, loop-invariant MXU RHS
    tile_m = bank_ref.shape[0]
    bn = o_ref.shape[-1]

    def body(c, carry):
        blk = bank_ref[pl.ds(c * chunk, chunk), :]                      # (chunk, D)
        sims = jnp.dot(blk, q, preferred_element_type=jnp.float32)      # (chunk, BN) f32
        # chunk -> 8 rows via elementwise maxes (VPU); the final 8 -> 1
        # cross-sublane reduce happens once, outside the kernel.
        part = jnp.max(sims.reshape(chunk // 8, 8, bn), axis=0)         # (8, BN)
        o_ref[...] = jnp.maximum(o_ref[...], part)
        return carry

    lax.fori_loop(0, tile_m // chunk, body, 0, unroll=True)


def fused_max_cosine_similarity(q_t, banks, *, tile_m=1024, split=2):
    """max-over-memory cosine similarity, batch folded into the lane axis.

    q_t   : (L, D, BN)  unit-norm bf16 queries, feature-major, BN % 128 == 0.
    banks : (L, M, D)   unit-norm bf16 memory banks.
    returns (L, BN) float32:  max_j <q_t[l, :, n], banks[l, j, :]>
    """
    L, D, BN = q_t.shape
    Lb, M, Db = banks.shape
    assert L == Lb and D == Db, "feature dims / layer counts must match"
    assert BN % 128 == 0, "lane dim must be padded to a multiple of 128"

    # Memory-axis split (fills both v7x TensorCores even when L == 1).
    split = max(1, min(split, M // 8))
    per_split = _round_up(pl.cdiv(M, split), 8)
    tile_m = _round_up(min(tile_m, per_split), 8)
    n_j = pl.cdiv(per_split, tile_m)
    m_pad = split * n_j * tile_m
    if m_pad != M:
        # Pad by replicating a real (unit-norm) row: duplicates never change the max.
        pad = jnp.broadcast_to(banks[:, :1, :], (L, m_pad - M, D))
        banks = jnp.concatenate([banks, pad], axis=1)

    # In-kernel compute chunk: keep the live (chunk, BN) f32 intermediate
    # around ~64 KiB of vregs (a quarter of the vreg file); must divide tile_m.
    chunk = max(8, min(tile_m, ((64 * 1024) // (BN * 4)) // 8 * 8))
    while tile_m % chunk != 0:
        chunk -= 8

    cost = pl.CostEstimate(
        flops=2 * L * m_pad * D * BN,
        transcendentals=0,
        bytes_accessed=int(q_t.size * q_t.dtype.itemsize      # queries, read once
                           + L * m_pad * D * 2                # banks, read ONCE (not B times)
                           + split * L * 8 * BN * 4),         # partial-max output
    )

    # VMEM budget: double-buffered bank tiles + query block + resident output.
    vmem_need = (2 * tile_m * D * 2) + (2 * D * BN * 2) + (2 * 8 * BN * 4)
    vmem_limit = int(min(max(2 * vmem_need, 32 * 1024 * 1024), 60 * 1024 * 1024))

    out = pl.pallas_call(
        functools.partial(_fused_max_cossim_kernel, chunk=chunk),
        out_shape=jax.ShapeDtypeStruct((split, L, 8, BN), jnp.float32),
        grid_spec=pltpu.PrefetchScalarGridSpec(
            num_scalar_prefetch=0,
            grid=(split, L, n_j),
            in_specs=[
                # query block (D, BN): constant across split and the reduction axis
                pl.BlockSpec((None, D, BN), lambda s, l, j: (l, 0, 0)),
                # memory-bank tile (tile_m, D), selected by layer l and split s
                pl.BlockSpec((None, tile_m, D),
                             lambda s, l, j, _n=n_j: (l, s * _n + j, 0)),
            ],
            out_specs=pl.BlockSpec((None, None, 8, BN),
                                   lambda s, l, j: (s, l, 0, 0)),
        ),
        compiler_params=pltpu.CompilerParams(
            dimension_semantics=("parallel", "parallel", "arbitrary"),
            vmem_limit_bytes=vmem_limit),
        cost_estimate=cost,
    )(q_t, banks)

    # Combine the per-split partial maxes and the 8 accumulator sublanes in XLA.
    return jnp.max(out, axis=(0, 2))                                   # (L, BN)


def max_cosine_retrieval(q, banks, *, tile_m=1024, split=2):
    """q: (L, B, N, D) f32 raw queries; banks: (L, M, D) unit-norm bf16.

    Normalizes, folds batch into the lane axis (padded to 128), runs the fused
    kernel, and returns (B, L, N) f32 max-over-memory cosine similarities.
    """
    L, B, N, D = q.shape
    q = l2_normalize(q)                                                 # f32, fused by XLA
    BN = B * N
    q_t = jnp.swapaxes(q.reshape(L, BN, D), -1, -2).astype(jnp.bfloat16)  # (L, D, BN)
    BN_pad = _round_up(BN, 128)
    if BN_pad != BN:
        q_t = jnp.pad(q_t, ((0, 0), (0, 0), (0, BN_pad - BN)))         # zero lanes
    sims = fused_max_cosine_similarity(q_t, banks, tile_m=tile_m, split=split)
    # Slice padded lanes off BEFORE any max over patches (padded cols read as 0).
    sims = sims[:, :BN].reshape(L, B, N)
    return jnp.swapaxes(sims, 0, 1)                                     # (B, L, N)


# ----------------------------------------------------------------------------
# Glue: deterministic stub "encoders" (patchify + fixed random projection).
# TODO(synk): the real pretrained CLIP ViT-L/14 and DINOv2 ViT-g/14 backbones
# cannot be reproduced in a synthetic kernel; these stubs only preserve the
# shape/dataflow of `encode_image(..., out_layers)` and `forward_features`.
# ----------------------------------------------------------------------------
def l2_normalize(x, eps=1e-8):
    # mirrors F.cosine_similarity eps handling (each norm clamped separately;
    # numerically equivalent to clamping the norm product for nonzero inputs)
    norm = jnp.sqrt(jnp.sum(jnp.square(x), axis=-1, keepdims=True))
    return x / jnp.maximum(norm, eps)


def patchify(img_nchw, patch):
    b, c, h, w = img_nchw.shape
    gh, gw = h // patch, w // patch
    x = img_nchw.reshape(b, c, gh, patch, gw, patch)
    x = x.transpose(0, 2, 4, 1, 3, 5).reshape(b, gh * gw, c * patch * patch)
    return x  # (B, num_patches, C*patch*patch)


def make_stub_params(key, in_dim):
    keys = jax.random.split(key, OUT_LAYERS + 3)
    clip_proj = [jax.random.normal(keys[i], (in_dim, CLIP_DIM), jnp.float32) * 0.02
                 for i in range(OUT_LAYERS)]
    clip_cls = jax.random.normal(keys[OUT_LAYERS], (1, CLIP_DIM), jnp.float32)
    dino_proj = jax.random.normal(keys[OUT_LAYERS + 1], (in_dim, DINO_DIM),
                                  jnp.float32) * 0.02
    return clip_proj, clip_cls, dino_proj


def clip_encode_image_stub(image, clip_proj, clip_cls):
    """Returns list of OUT_LAYERS tensors shaped (B, 1+N, 1024) (CLS + patches)."""
    patches = patchify(image, PATCH)                      # (B, N, in_dim)
    b = patches.shape[0]
    tokens = []
    for w in clip_proj:
        pt = jnp.tanh(patches @ w)                        # (B, N, 1024)
        cls = jnp.broadcast_to(clip_cls[None], (b, 1, CLIP_DIM))
        tokens.append(jnp.concatenate([cls, pt], axis=1))  # (B, 1+N, 1024)
    return tokens


def dino_forward_features_stub(image, dino_proj):
    patches = patchify(image, PATCH)                      # (B, N, in_dim)
    return jnp.tanh(patches @ dino_proj)                  # (B, N, 1536)


def decoder_strip_cls(tokens):
    """LinearLayer: drop the CLS token from each (B, 1+N, D) tensor."""
    return [t[:, 1:, :] for t in tokens]


def prepare_memory_banks(normal_patch_tokens, normal_dino_patches):
    """setup(): L2-normalize the static banks ONCE and cast to bf16 for the MXU."""
    clip_banks = jnp.stack(
        [l2_normalize(normal_patch_tokens[i])
         for i in range(OUT_LAYERS) if i % 2 == 1], axis=0)          # (Lsel, M, 1024)
    dino_bank = l2_normalize(normal_dino_patches)[None]              # (1, Md, 1536)
    return clip_banks.astype(jnp.bfloat16), dino_bank.astype(jnp.bfloat16)


# ----------------------------------------------------------------------------
# Model.forward equivalent (structure-score branch, class like 'juice_bottle').
# The reference's per-sample Python loop is replaced by an identical batched
# computation; per-layer / DINO retrievals are fused into two pallas_calls.
# TODO(synk): 'pushpins' topk(5).mean() variant, the pushpins/screw_bag branch
# that skips the DINO term, and the mask-based logical_score
# (GroundingDINO + SAM + cv2 + file I/O) are not translatable; the
# logical_score term is fixed to 0.
# ----------------------------------------------------------------------------
@jax.jit
def forward(image, params, clip_banks, dino_bank):
    clip_proj, clip_cls, dino_proj = params

    patch_tokens = clip_encode_image_stub(image, clip_proj, clip_cls)
    patch_tokens = decoder_strip_cls(patch_tokens)                  # [(B, N, 1024)]
    dino_tokens = dino_forward_features_stub(image, dino_proj)      # (B, N, 1536)

    # Queries for layers i % 2 == 1, stacked layer-major for the fused kernel.
    q_clip = jnp.stack([patch_tokens[i] for i in range(OUT_LAYERS) if i % 2 == 1],
                       axis=0)                                      # (Lsel, B, N, 1024)
    q_dino = dino_tokens[None]                                      # (1, B, N, 1536)

    sim_clip = max_cosine_retrieval(q_clip, clip_banks)             # (B, Lsel, N)
    sim_dino = max_cosine_retrieval(q_dino, dino_bank)              # (B, 1, N)

    anomaly_map_ret = 1.0 - jnp.mean(sim_clip, axis=1)              # (B, N)
    anomaly_map_structure = anomaly_map_ret + (1.0 - sim_dino[:, 0])  # (B, N)
    structure_score = jnp.max(anomaly_map_structure, axis=-1)       # (B,)

    logical_score = 0.0  # TODO(synk): mask/part-count logic not translatable
    pred_scores = 1.0 * logical_score + 1.0 * structure_score
    return {"image": image, "pred_score": pred_scores}


if __name__ == "__main__":
    key = jax.random.PRNGKey(0)
    k_img, k_params, k_mem_clip, k_mem_dino = jax.random.split(key, 4)

    # Small but layout-consistent shapes: 112/14 = 8 -> 64 patches per image,
    # so the folded lane dim B*N = 128 (one full lane tile).
    B, C, H, W = 2, 3, 112, 112
    N_MEM = 256  # synthetic "coreset" memory size (GreedyCoresetSampler stub)

    image = jax.random.normal(k_img, (B, C, H, W), jnp.float32)
    params = make_stub_params(k_params, C * PATCH * PATCH)

    # Synthetic normal-feature memory banks (setup() output stand-ins).
    mem_keys = jax.random.split(k_mem_clip, OUT_LAYERS)
    normal_patch_tokens = [
        jax.random.normal(mem_keys[i], (N_MEM, CLIP_DIM), jnp.float32)
        for i in range(OUT_LAYERS)
    ]
    normal_dino_patches = jax.random.normal(k_mem_dino, (N_MEM, DINO_DIM),
                                            jnp.float32)

    clip_banks, dino_bank = prepare_memory_banks(normal_patch_tokens,
                                                 normal_dino_patches)

    out = forward(image, params, clip_banks, dino_bank)
    jax.block_until_ready(out["pred_score"])
    assert out["pred_score"].shape == (B,)
    print("KERNEL_OK")
</pallas_src>

<mosaic_0001>
module attributes {stable_mosaic.version = 11 : i64} {
  func.func @_fused_max_cossim_kernel(%arg0: i32, %arg1: i32, %arg2: i32, %arg3: memref<1x1024x128xbf16, #tpu.memory_space<vmem>>, %arg4: memref<1x128x1024xbf16, #tpu.memory_space<vmem>>, %arg5: memref<1x1x8x128xf32, #tpu.memory_space<vmem>>) attributes {dimension_semantics = [#tpu.dimension_semantics<parallel>, #tpu.dimension_semantics<parallel>, #tpu.dimension_semantics<arbitrary>], iteration_bounds = array<i64: 2, 2, 1>, scalar_prefetch = 0 : i64, scratch_operands = 0 : i64, tpu.core_type = #tpu.core_type<tc>, window_params = [{transform_indices = @transform_0, window_bounds = array<i64: 1, 1024, 128>}, {transform_indices = @transform_1, window_bounds = array<i64: 1, 128, 1024>}, {transform_indices = @transform_2, window_bounds = array<i64: 1, 1, 8, 128>}]} {
    %c0_i32 = arith.constant 0 : i32
    %0 = arith.cmpi eq, %arg2, %c0_i32 : i32
    %1 = arith.extui %0 : i1 to i32
    %c0_i32_0 = arith.constant 0 : i32
    %2 = arith.cmpi ne, %1, %c0_i32_0 : i32
    scf.if %2 {
      %cst_15 = arith.constant 0xFF800000 : f32
      %18 = vector.broadcast %cst_15 : f32 to vector<8x128xf32>
      %c0_16 = arith.constant 0 : index
      %c0_17 = arith.constant 0 : index
      %c0_18 = arith.constant 0 : index
      %c0_19 = arith.constant 0 : index
      %19 = vector.load %arg5[%c0_16, %c0_17, %c0_18, %c0_19] : memref<1x1x8x128xf32, #tpu.memory_space<vmem>>, vector<1x1x8x128xf32>
      %20 = vector.shape_cast %19 : vector<1x1x8x128xf32> to vector<8x128xf32>
      %21 = vector.shape_cast %18 : vector<8x128xf32> to vector<1x1x8x128xf32>
      tpu.vector_store %arg5[%c0_16, %c0_17, %c0_18, %c0_19], %21 {strides = array<i32>} : memref<1x1x8x128xf32, #tpu.memory_space<vmem>>, vector<1x1x8x128xf32>,
    } else {
    }
    %c0 = arith.constant 0 : index
    %c0_1 = arith.constant 0 : index
    %c0_2 = arith.constant 0 : index
    %3 = vector.load %arg3[%c0, %c0_1, %c0_2] : memref<1x1024x128xbf16, #tpu.memory_space<vmem>>, vector<1x1024x128xbf16>
    %4 = vector.shape_cast %3 : vector<1x1024x128xbf16> to vector<1024x128xbf16>
    %c0_i32_3 = arith.constant 0 : i32
    %c128_i32 = arith.constant 128 : i32
    %5 = arith.muli %c0_i32_3, %c128_i32 : i32
    %c0_4 = arith.constant 0 : index
    %6 = arith.index_cast %5 : i32 to index
    %c0_5 = arith.constant 0 : index
    %7 = vector.load %arg4[%c0_4, %6, %c0_5] : memref<1x128x1024xbf16, #tpu.memory_space<vmem>>, vector<1x128x1024xbf16>
    %8 = vector.shape_cast %7 : vector<1x128x1024xbf16> to vector<128x1024xbf16>
    %cst = arith.constant dense<0.000000e+00> : vector<128x128xf32>
    %9 = tpu.matmul %8, %4, %cst {dimension_numbers = #tpu.dot_dimension_numbers<[1], [0], [0], [1], [0, 0, 1, 1], [], []>} : vector<128x1024xbf16>, vector<1024x128xbf16>, vector<128x128xf32> -> vector<128x128xf32>
    %10 = vector.shape_cast %9 : vector<128x128xf32> to vector<16x8x128xf32>
    %cst_6 = arith.constant dense<0xFF800000> : vector<8x128xf32>
    %11 = vector.multi_reduction <maximumf>, %10, %cst_6 [0] : vector<16x8x128xf32> to vector<8x128xf32>
    %c0_7 = arith.constant 0 : index
    %c0_8 = arith.constant 0 : index
    %c0_9 = arith.constant 0 : index
    %c0_10 = arith.constant 0 : index
    %12 = vector.load %arg5[%c0_7, %c0_8, %c0_9, %c0_10] : memref<1x1x8x128xf32, #tpu.memory_space<vmem>>, vector<1x1x8x128xf32>
    %13 = vector.shape_cast %12 : vector<1x1x8x128xf32> to vector<8x128xf32>
    %14 = arith.maximumf %13, %11 : vector<8x128xf32>
    %c0_11 = arith.constant 0 : index
    %c0_12 = arith.constant 0 : index
    %c0_13 = arith.constant 0 : index
    %c0_14 = arith.constant 0 : index
    %15 = vector.load %arg5[%c0_11, %c0_12, %c0_13, %c0_14] : memref<1x1x8x128xf32, #tpu.memory_space<vmem>>, vector<1x1x8x128xf32>
    %16 = vector.shape_cast %15 : vector<1x1x8x128xf32> to vector<8x128xf32>
    %17 = vector.shape_cast %14 : vector<8x128xf32> to vector<1x1x8x128xf32>
    tpu.vector_store %arg5[%c0_11, %c0_12, %c0_13, %c0_14], %17 {strides = array<i32>} : memref<1x1x8x128xf32, #tpu.memory_space<vmem>>, vector<1x1x8x128xf32>,
    %c1_i32 = arith.constant 1 : i32
    return
  }
  func.func @transform_0(%arg0: i32, %arg1: i32, %arg2: i32) -> (i32, i32, i32) {
    %c0_i32 = arith.constant 0 : i32
    %c0_i32_0 = arith.constant 0 : i32
    %c0_i32_1 = arith.constant 0 : i32
    return %arg1, %c0_i32, %c0_i32_0 : i32, i32, i32
  }
  func.func @transform_1(%arg0: i32, %arg1: i32, %arg2: i32) -> (i32, i32, i32) {
    %c1_i32 = arith.constant 1 : i32
    %0 = arith.muli %arg0, %c1_i32 : i32
    %1 = arith.addi %0, %arg2 : i32
    %c0_i32 = arith.constant 0 : i32
    %c0_i32_0 = arith.constant 0 : i32
    return %arg1, %1, %c0_i32 : i32, i32, i32
  }
  func.func @transform_2(%arg0: i32, %arg1: i32, %arg2: i32) -> (i32, i32, i32, i32) {
    %c0_i32 = arith.constant 0 : i32
    %c0_i32_0 = arith.constant 0 : i32
    %c0_i32_1 = arith.constant 0 : i32
    return %arg0, %arg1, %c0_i32, %c0_i32_0 : i32, i32, i32, i32
  }
}

module attributes {stable_mosaic.version = 11 : i64} {
  func.func @_fused_max_cossim_kernel(%arg0: i32, %arg1: i32, %arg2: i32, %arg3: memref<1x1536x128xbf16, #tpu.memory_space<vmem>>, %arg4: memref<1x128x1536xbf16, #tpu.memory_space<vmem>>, %arg5: memref<1x1x8x128xf32, #tpu.memory_space<vmem>>) attributes {dimension_semantics = [#tpu.dimension_semantics<parallel>, #tpu.dimension_semantics<parallel>, #tpu.dimension_semantics<arbitrary>], iteration_bounds = array<i64: 2, 1, 1>, scalar_prefetch = 0 : i64, scratch_operands = 0 : i64, tpu.core_type = #tpu.core_type<tc>, window_params = [{transform_indices = @transform_0, window_bounds = array<i64: 1, 1536, 128>}, {transform_indices = @transform_1, window_bounds = array<i64: 1, 128, 1536>}, {transform_indices = @transform_2, window_bounds = array<i64: 1, 1, 8, 128>}]} {
    %c0_i32 = arith.constant 0 : i32
    %0 = arith.cmpi eq, %arg2, %c0_i32 : i32
    %1 = arith.extui %0 : i1 to i32
    %c0_i32_0 = arith.constant 0 : i32
    %2 = arith.cmpi ne, %1, %c0_i32_0 : i32
    scf.if %2 {
      %cst_15 = arith.constant 0xFF800000 : f32
      %18 = vector.broadcast %cst_15 : f32 to vector<8x128xf32>
      %c0_16 = arith.constant 0 : index
      %c0_17 = arith.constant 0 : index
      %c0_18 = arith.constant 0 : index
      %c0_19 = arith.constant 0 : index
      %19 = vector.load %arg5[%c0_16, %c0_17, %c0_18, %c0_19] : memref<1x1x8x128xf32, #tpu.memory_space<vmem>>, vector<1x1x8x128xf32>
      %20 = vector.shape_cast %19 : vector<1x1x8x128xf32> to vector<8x128xf32>
      %21 = vector.shape_cast %18 : vector<8x128xf32> to vector<1x1x8x128xf32>
      tpu.vector_store %arg5[%c0_16, %c0_17, %c0_18, %c0_19], %21 {strides = array<i32>} : memref<1x1x8x128xf32, #tpu.memory_space<vmem>>, vector<1x1x8x128xf32>,
    } else {
    }
    %c0 = arith.constant 0 : index
    %c0_1 = arith.constant 0 : index
    %c0_2 = arith.constant 0 : index
    %3 = vector.load %arg3[%c0, %c0_1, %c0_2] : memref<1x1536x128xbf16, #tpu.memory_space<vmem>>, vector<1x1536x128xbf16>
    %4 = vector.shape_cast %3 : vector<1x1536x128xbf16> to vector<1536x128xbf16>
    %c0_i32_3 = arith.constant 0 : i32
    %c128_i32 = arith.constant 128 : i32
    %5 = arith.muli %c0_i32_3, %c128_i32 : i32
    %c0_4 = arith.constant 0 : index
    %6 = arith.index_cast %5 : i32 to index
    %c0_5 = arith.constant 0 : index
    %7 = vector.load %arg4[%c0_4, %6, %c0_5] : memref<1x128x1536xbf16, #tpu.memory_space<vmem>>, vector<1x128x1536xbf16>
    %8 = vector.shape_cast %7 : vector<1x128x1536xbf16> to vector<128x1536xbf16>
    %cst = arith.constant dense<0.000000e+00> : vector<128x128xf32>
    %9 = tpu.matmul %8, %4, %cst {dimension_numbers = #tpu.dot_dimension_numbers<[1], [0], [0], [1], [0, 0, 1, 1], [], []>} : vector<128x1536xbf16>, vector<1536x128xbf16>, vector<128x128xf32> -> vector<128x128xf32>
    %10 = vector.shape_cast %9 : vector<128x128xf32> to vector<16x8x128xf32>
    %cst_6 = arith.constant dense<0xFF800000> : vector<8x128xf32>
    %11 = vector.multi_reduction <maximumf>, %10, %cst_6 [0] : vector<16x8x128xf32> to vector<8x128xf32>
    %c0_7 = arith.constant 0 : index
    %c0_8 = arith.constant 0 : index
    %c0_9 = arith.constant 0 : index
    %c0_10 = arith.constant 0 : index
    %12 = vector.load %arg5[%c0_7, %c0_8, %c0_9, %c0_10] : memref<1x1x8x128xf32, #tpu.memory_space<vmem>>, vector<1x1x8x128xf32>
    %13 = vector.shape_cast %12 : vector<1x1x8x128xf32> to vector<8x128xf32>
    %14 = arith.maximumf %13, %11 : vector<8x128xf32>
    %c0_11 = arith.constant 0 : index
    %c0_12 = arith.constant 0 : index
    %c0_13 = arith.constant 0 : index
    %c0_14 = arith.constant 0 : index
    %15 = vector.load %arg5[%c0_11, %c0_12, %c0_13, %c0_14] : memref<1x1x8x128xf32, #tpu.memory_space<vmem>>, vector<1x1x8x128xf32>
    %16 = vector.shape_cast %15 : vector<1x1x8x128xf32> to vector<8x128xf32>
    %17 = vector.shape_cast %14 : vector<8x128xf32> to vector<1x1x8x128xf32>
    tpu.vector_store %arg5[%c0_11, %c0_12, %c0_13, %c0_14], %17 {strides = array<i32>} : memref<1x1x8x128xf32, #tpu.memory_space<vmem>>, vector<1x1x8x128xf32>,
    %c1_i32 = arith.constant 1 : i32
    return
  }
  func.func @transform_0(%arg0: i32, %arg1: i32, %arg2: i32) -> (i32, i32, i32) {
    %c0_i32 = arith.constant 0 : i32
    %c0_i32_0 = arith.constant 0 : i32
    %c0_i32_1 = arith.constant 0 : i32
    return %arg1, %c0_i32, %c0_i32_0 : i32, i32, i32
  }
  func.func @transform_1(%arg0: i32, %arg1: i32, %arg2: i32) -> (i32, i32, i32) {
    %c1_i32 = arith.constant 1 : i32
    %0 = arith.muli %arg0, %c1_i32 : i32
    %1 = arith.addi %0, %arg2 : i32
    %c0_i32 = arith.constant 0 : i32
    %c0_i32_0 = arith.constant 0 : i32
    return %arg1, %1, %c0_i32 : i32, i32, i32
  }
  func.func @transform_2(%arg0: i32, %arg1: i32, %arg2: i32) -> (i32, i32, i32, i32) {
    %c0_i32 = arith.constant 0 : i32
    %c0_i32_0 = arith.constant 0 : i32
    %c0_i32_1 = arith.constant 0 : i32
    return %arg0, %arg1, %c0_i32, %c0_i32_0 : i32, i32, i32, i32
  }
}

</mosaic_0001>

<bundles_post_ra>
// kernel: forward.2
= control target key start
LH: loop header
LB: loop body
LE: loop exit
PB: predicated region body
PF: predicated region fallthrough
CT: control target
= control target key end

     0   :  { %s2384_s9 = smov 0   ;;  %s2386_s10 = smov 0   ;;  %s2704_s0 = inlined_call_operand.vmem [shape: bf16[2,1024,128], index: 0, kind: input, shape index: {}]   ;;  %s2705_s1 = inlined_call_operand.vmem [shape: bf16[2,256,1024], index: 1, kind: input, shape index: {}]   ;;  %s2706_s2 = inlined_call_operand.vmem [shape: f32[2,2,8,128], index: 2, kind: output, shape index: {}]  }
   0x1   :  { %s2388_s11 = smov 0   ;;  %s2390_s12 = smov 0  }
   0x2   :  { %s2392_s13 = smov 0  }
   0x3 LB: > { %s27_s14 = sadd.s32 1, %s2359_s11  ;;  %s31_s15 = sadd.s32 1, %s2363_s12  ;;  %s2367_s13 = sphi %s2392_s13, %s12_s13   ;;  %s2363_s12 = sphi %s2390_s12, %s2710_s12   ;;  %s2359_s11 = sphi %s2388_s11, %s2709_s11   ;;  %s2355_s10 = sphi %s2386_s10, %s2708_s10   ;;  %s2351_s9 = sphi %s2384_s9, %s2707_s9  }
   0x4   : > { %p29_p0 = scmp.ge.s32.totalorder %s27_s14, 2  ;;  %p1636_p1 = scmp.ge.s32.totalorder %s2367_s13, 1 }
   0x5   : > { %p155_p2 = scmp.lt.s32.totalorder %s2367_s13, 5 }
   0x6   : > { %s2712_s14 = smov (%p29_p0, %s27_s14), 0  ;;  %s2714_s15 = smov (!%p29_p0, %s31_s15), %s2363_s12 }
   0x7   : > { %p156_p3 = pnand %p1636_p1, %p155_p2  ;;  %p33_p4 = scmp.ge.s32.totalorder %s2714_s15, 2 }
   0x8   : > { %p191_p5 = scmp.lt.s32.totalorder (!%p156_p3), %s2351_s9, 1  ;;  %s1639_s20 = sshll.u32 (!%p156_p3), %s2355_s10, 4 }
   0x9   : > { %s2716_s15 = smov (%p33_p4, %s2714_s15), 0  ;;  %159 = sbr.rel (%p156_p3) target bundleno = 442 (0x1ba), region = 28 }
   0xa   : > { %p200_p6 = scmp.lt.s32.totalorder (!%p156_p3), %s1639_s20, 31  ;;  %p209_p7 = scmp.lt.s32.totalorder (!%p156_p3), %s2355_s10, 1 }
   0xe   : > { %s2718_s9 = smov (!%p191_p5, %s2351_s9), 1  ;;  %s2720_s20 = smov (!%p200_p6, %s1639_s20), 31 }
   0xf   : > { %s2159_s16 = sshll.u32 %s2718_s9, 9  ;;  %s1640_s21 = sshll.u32 %s2720_s20, 3 }
  0x10   : > { %s2422_s19 = scalar_lea.vmem %s2704_s0, %s2159_s16  ;;  %s1641_s22 = sshll.u32 %s2718_s9, 8 }
  0x11   : > { %v2167_v0 = vld [vmem:[%s2422_s19 + $0x38] sm:$0xff]  ;;  %v2166_v4 = vld [vmem:[%s2422_s19 + $0x30] sm:$0xff]  ;;  %v2165_v8 = vld [vmem:[%s2422_s19 + $0x28] sm:$0xff]  ;;  %s204_s23 = sadd.s32 %s1641_s22, %s1640_s21  ;;  %s2722_s10 = smov (!%p209_p7, %s2355_s10), 1 }
  0x12   : > { %v2175_v1 = vld [vmem:[%s2422_s19 + $0x78] sm:$0xff]  ;;  %1118 = vmatpush.bf16.msra.mxu0 %v2167_v0  ;;  %v2174_v5 = vld [vmem:[%s2422_s19 + $0x70] sm:$0xff]  ;;  %v2173_v9 = vld [vmem:[%s2422_s19 + $0x68] sm:$0xff]  ;;  %s1642_s24 = sshll.u32 %s204_s23, 2  ;;  %s1643_s28 = sshll.u32 %s2722_s10, 1 }
  0x13   : > { %v2183_v2 = vld [vmem:[%s2422_s19 + $0xb8] sm:$0xff]  ;;  %1167 = vmatpush.bf16.msra.mxu1 %v2175_v1  ;;  %v2182_v6 = vld [vmem:[%s2422_s19 + $0xb0] sm:$0xff]  ;;  %v2181_v10 = vld [vmem:[%s2422_s19 + $0xa8] sm:$0xff]  ;;  %s2455_s27 = scalar_lea.vmem %s2705_s1, %s1642_s24  ;;  %s214_s29 = sadd.s32 %s1643_s28, %s2718_s9 }
  0x14   : > { %v2191_v3 = vld [vmem:[%s2422_s19 + $0xf8] sm:$0xff]  ;;  %1216 = vmatpush.bf16.msra.mxu2 %v2183_v2  ;;  %v2190_v7 = vld [vmem:[%s2422_s19 + $0xf0] sm:$0xff]  ;;  %v2189_v11 = vld [vmem:[%s2422_s19 + $0xe8] sm:$0xff]  ;;  %s1644_s30 = sshll.u32 %s214_s29, 3 }
  0x15   : > { %1265 = vmatpush.bf16.msra.mxu3 %v2191_v3  ;;  %v2164_v12 = vld [vmem:[%s2422_s19 + $0x20] sm:$0xff]  ;;  %v2163_v16 = vld [vmem:[%s2422_s19 + $0x18] sm:$0xff]  ;;  %v2162_v20 = vld [vmem:[%s2422_s19 + $0x10] sm:$0xff]  ;;  %s216_s5 = scalar_lea.vmem %s2706_s2, %s1644_s30 }
  0x16   : > { %1119 = vmatpush.bf16.msra.mxu0 %v2166_v4  ;;  %v2172_v13 = vld [vmem:[%s2422_s19 + $0x60] sm:$0xff]  ;;  %v2171_v17 = vld [vmem:[%s2422_s19 + $0x58] sm:$0xff]  ;;  %v2170_v21 = vld [vmem:[%s2422_s19 + $0x50] sm:$0xff] }
  0x17   : > { %1168 = vmatpush.bf16.msra.mxu1 %v2174_v5  ;;  %v2180_v14 = vld [vmem:[%s2422_s19 + $0xa0] sm:$0xff]  ;;  %v2179_v18 = vld [vmem:[%s2422_s19 + $0x98] sm:$0xff]  ;;  %v2178_v22 = vld [vmem:[%s2422_s19 + $0x90] sm:$0xff] }
  0x18   : > { %1217 = vmatpush.bf16.msra.mxu2 %v2182_v6  ;;  %v2188_v15 = vld [vmem:[%s2422_s19 + $0xe0] sm:$0xff]  ;;  %v2187_v19 = vld [vmem:[%s2422_s19 + $0xd8] sm:$0xff]  ;;  %v2186_v23 = vld [vmem:[%s2422_s19 + $0xd0] sm:$0xff] }
  0x19   : > { %1266 = vmatpush.bf16.msra.mxu3 %v2190_v7  ;;  %v2161_v24 = vld [vmem:[%s2422_s19 + $0x8] sm:$0xff]  ;;  %v2160_v28 = vld [vmem:[%s2422_s19] sm:$0xff]  ;;  %v2215_v40 = vld [vmem:[%s2422_s19 + $0x1b8] sm:$0xff] }
  0x1a   : > { %1120 = vmatpush.bf16.msra.mxu0 %v2165_v8  ;;  %v2169_v25 = vld [vmem:[%s2422_s19 + $0x48] sm:$0xff]  ;;  %v2168_v29 = vld [vmem:[%s2422_s19 + $0x40] sm:$0xff]  ;;  %v2199_v41 = vld [vmem:[%s2422_s19 + $0x138] sm:$0xff] }
  0x1b   : > { %1169 = vmatpush.bf16.msra.mxu1 %v2173_v9  ;;  %v2177_v26 = vld [vmem:[%s2422_s19 + $0x88] sm:$0xff]  ;;  %v2176_v30 = vld [vmem:[%s2422_s19 + $0x80] sm:$0xff]  ;;  %v2223_v46 = vld [vmem:[%s2422_s19 + $0x1f8] sm:$0xff] }
  0x1c   : > { %1218 = vmatpush.bf16.msra.mxu2 %v2181_v10  ;;  %v2185_v27 = vld [vmem:[%s2422_s19 + $0xc8] sm:$0xff]  ;;  %v2184_v31 = vld [vmem:[%s2422_s19 + $0xc0] sm:$0xff]  ;;  %v2207_v47 = vld [vmem:[%s2422_s19 + $0x178] sm:$0xff] }
  0x1d   : > { %1267 = vmatpush.bf16.msra.mxu3 %v2189_v11  ;;  %v1647_v32 = vld [vmem:[%s2455_s27] sm:$0xf]  ;;  %v2224_v34 = vld [vmem:[%s2455_s27 + $0x4] sm:$0xf]  ;;  %v1655_v36 = vld [vmem:[%s2455_s27 + $0x8] sm:$0xf] }
  0x1e   : > { %1121 = vmatpush.bf16.msra.mxu0 %v2164_v12  ;;  %v2228_v33 = vld [vmem:[%s2455_s27 + $0x1c] sm:$0xf0]  ;;  %v1649_v35 = vld [vmem:[%s2455_s27 + $0x20] sm:$0xf0]  ;;  %v2229_v37 = vld [vmem:[%s2455_s27 + $0x24] sm:$0xf0] }
  0x1f   : > { %1170 = vmatpush.bf16.msra.mxu1 %v2172_v13  ;;  %v2225_v38 = vld [vmem:[%s2455_s27 + $0xc] sm:$0xf]  ;;  %v1648_v42 = vor.u32 %v2228_v33, %v1647_v32  ;;  %v1652_v43 = vor.u32 %v2224_v34, %v1649_v35  ;;  %v1656_v44 = vor.u32 %v2229_v37, %v1655_v36  ;;  %v2214_v48 = vld [vmem:[%s2422_s19 + $0x1b0] sm:$0xff]  ;;  %v1679_v56 = vld [vmem:[%s2455_s27 + $0x40] sm:$0xf] }
  0x20   : > { %1219 = vmatpush.bf16.msra.mxu2 %v2180_v14  ;;  %v1657_v39 = vld [vmem:[%s2455_s27 + $0x28] sm:$0xf0]  ;;  %v2198_v49 = vld [vmem:[%s2422_s19 + $0x130] sm:$0xff]  ;;  %v2236_v57 = vld [vmem:[%s2455_s27 + $0x5c] sm:$0xf0] }
  0x21   : > { %1268 = vmatpush.bf16.msra.mxu3 %v2188_v15  ;;  %v1660_v45 = vor.u32 %v2225_v38, %v1657_v39  ;;  %v2222_v50 = vld [vmem:[%s2422_s19 + $0x1f0] sm:$0xff]  ;;  %v2213_v52 = vld [vmem:[%s2422_s19 + $0x1a8] sm:$0xff]  ;;  %v2232_v58 = vld [vmem:[%s2455_s27 + $0x44] sm:$0xf]  ;;  %v1680_v0 = vor.u32 %v2236_v57, %v1679_v56 }
  0x22   : > { %1122 = vmatpush.bf16.msra.mxu0 %v2163_v16  ;;  %v2206_v51 = vld [vmem:[%s2422_s19 + $0x170] sm:$0xff]  ;;  %v2197_v53 = vld [vmem:[%s2422_s19 + $0x128] sm:$0xff]  ;;  %v1681_v59 = vld [vmem:[%s2455_s27 + $0x60] sm:$0xf0] }
  0x23   : > { %1171 = vmatpush.bf16.msra.mxu1 %v2171_v17  ;;  %v2221_v54 = vld [vmem:[%s2422_s19 + $0x1e8] sm:$0xff]  ;;  %v1684_v1 = vor.u32 %v2232_v58, %v1681_v59  ;;  %v2212_v4 = vld [vmem:[%s2422_s19 + $0x1a0] sm:$0xff]  ;;  %v2210_v36 = vld [vmem:[%s2422_s19 + $0x190] sm:$0xff] }
  0x24   : > { %1220 = vmatpush.bf16.msra.mxu2 %v2179_v18  ;;  %v2205_v55 = vld [vmem:[%s2422_s19 + $0x168] sm:$0xff]  ;;  %v2196_v5 = vld [vmem:[%s2422_s19 + $0x120] sm:$0xff]  ;;  %v2194_v37 = vld [vmem:[%s2422_s19 + $0x110] sm:$0xff] }
  0x25   : > { %1269 = vmatpush.bf16.msra.mxu3 %v2187_v19  ;;  %v1687_v60 = vld [vmem:[%s2455_s27 + $0x48] sm:$0xf]  ;;  %v2233_v62 = vld [vmem:[%s2455_s27 + $0x4c] sm:$0xf]  ;;  %v2220_v6 = vld [vmem:[%s2422_s19 + $0x1e0] sm:$0xff] }
  0x26   : > { %1123 = vmatpush.bf16.msra.mxu0 %v2162_v20  ;;  %v2237_v61 = vld [vmem:[%s2455_s27 + $0x64] sm:$0xf0]  ;;  %v1689_v63 = vld [vmem:[%s2455_s27 + $0x68] sm:$0xf0]  ;;  %v2204_v7 = vld [vmem:[%s2422_s19 + $0x160] sm:$0xff] }
  0x27   : > { %1172 = vmatpush.bf16.msra.mxu1 %v2170_v21  ;;  %v1688_v2 = vor.u32 %v2237_v61, %v1687_v60  ;;  %v1692_v3 = vor.u32 %v2233_v62, %v1689_v63  ;;  %v1711_v8 = vld [vmem:[%s2455_s27 + $0x80] sm:$0xf]  ;;  %v2240_v10 = vld [vmem:[%s2455_s27 + $0x84] sm:$0xf]  ;;  %v1719_v12 = vld [vmem:[%s2455_s27 + $0x88] sm:$0xf] }
  0x28   : > { %1221 = vmatpush.bf16.msra.mxu2 %v2178_v22  ;;  %v2244_v9 = vld [vmem:[%s2455_s27 + $0x9c] sm:$0xf0]  ;;  %v1713_v11 = vld [vmem:[%s2455_s27 + $0xa0] sm:$0xf0]  ;;  %v2245_v13 = vld [vmem:[%s2455_s27 + $0xa4] sm:$0xf0] }
  0x29   : > { %1270 = vmatpush.bf16.msra.mxu3 %v2186_v23  ;;  %v2241_v14 = vld [vmem:[%s2455_s27 + $0x8c] sm:$0xf]  ;;  %v1712_v16 = vor.u32 %v2244_v9, %v1711_v8  ;;  %v1716_v17 = vor.u32 %v2240_v10, %v1713_v11  ;;  %v1720_v18 = vor.u32 %v2245_v13, %v1719_v12  ;;  %v2211_v20 = vld [vmem:[%s2422_s19 + $0x198] sm:$0xff]  ;;  %v2218_v38 = vld [vmem:[%s2422_s19 + $0x1d0] sm:$0xff] }
  0x2a   : > { %1124 = vmatpush.bf16.msra.mxu0 %v2161_v24  ;;  %v1721_v15 = vld [vmem:[%s2455_s27 + $0xa8] sm:$0xf0]  ;;  %v2195_v21 = vld [vmem:[%s2422_s19 + $0x118] sm:$0xff]  ;;  %v1743_v24 = vld [vmem:[%s2455_s27 + $0xc0] sm:$0xf] }
  0x2b   : > { %1173 = vmatpush.bf16.msra.mxu1 %v2169_v25  ;;  %v1724_v19 = vor.u32 %v2241_v14, %v1721_v15  ;;  %v2219_v22 = vld [vmem:[%s2422_s19 + $0x1d8] sm:$0xff]  ;;  %v2252_v25 = vld [vmem:[%s2455_s27 + $0xdc] sm:$0xf0]  ;;  %v2202_v39 = vld [vmem:[%s2422_s19 + $0x150] sm:$0xff] }
  0x2c   : > { %1222 = vmatpush.bf16.msra.mxu2 %v2177_v26  ;;  %v2203_v23 = vld [vmem:[%s2422_s19 + $0x158] sm:$0xff]  ;;  %v2248_v26 = vld [vmem:[%s2455_s27 + $0xc4] sm:$0xf]  ;;  %v1744_v32 = vor.u32 %v2252_v25, %v1743_v24  ;;  %v1807_v56 = vld [vmem:[%s2455_s27 + $0x140] sm:$0xf] }
  0x2d   : > { %1271 = vmatpush.bf16.msra.mxu3 %v2185_v27  ;;  %v1745_v27 = vld [vmem:[%s2455_s27 + $0xe0] sm:$0xf0]  ;;  %v2268_v57 = vld [vmem:[%s2455_s27 + $0x15c] sm:$0xf0]  ;;  %v1815_v60 = vld [vmem:[%s2455_s27 + $0x148] sm:$0xf] }
  0x2e   : > { %1125 = vmatpush.bf16.msra.mxu0 %v2160_v28  ;;  %v1751_v28 = vld [vmem:[%s2455_s27 + $0xc8] sm:$0xf]  ;;  %v1748_v33 = vor.u32 %v2248_v26, %v1745_v27  ;;  %v2264_v58 = vld [vmem:[%s2455_s27 + $0x144] sm:$0xf]  ;;  %v2265_v62 = vld [vmem:[%s2455_s27 + $0x14c] sm:$0xf] }
  0x2f   : > { %1174 = vmatpush.bf16.msra.mxu1 %v2168_v29  ;;  %v2253_v29 = vld [vmem:[%s2455_s27 + $0xe4] sm:$0xf0]  ;;  %v1809_v59 = vld [vmem:[%s2455_s27 + $0x160] sm:$0xf0]  ;;  %v1817_v63 = vld [vmem:[%s2455_s27 + $0x168] sm:$0xf0] }
  0x30   : > { %1223 = vmatpush.bf16.msra.mxu2 %v2176_v30  ;;  %v2249_v30 = vld [vmem:[%s2455_s27 + $0xcc] sm:$0xf]  ;;  %v1752_v34 = vor.u32 %v2253_v29, %v1751_v28  ;;  %v2269_v61 = vld [vmem:[%s2455_s27 + $0x164] sm:$0xf0]  ;;  %v1839_v8 = vld [vmem:[%s2455_s27 + $0x180] sm:$0xf] }
  0x31   : > { %1272 = vmatpush.bf16.msra.mxu3 %v2184_v31  ;;  %1126 = vmatmul.bf16.vlgmr.msra.gmra.mxu0 %v1648_v42  ;;  %v1753_v31 = vld [vmem:[%s2455_s27 + $0xe8] sm:$0xf0]  ;;  %v2256_v42 = vld [vmem:[%s2455_s27 + $0x104] sm:$0xf]  ;;  %v2276_v9 = vld [vmem:[%s2455_s27 + $0x19c] sm:$0xf0] }
  0x32   : > { %1314 = vmatpush.bf16.msrb.mxu0 %v2199_v41  ;;  %1175 = vmatmul.bf16.vlgmr.msra.gmra.mxu1 %v1652_v43  ;;  %v1756_v35 = vor.u32 %v2249_v30, %v1753_v31  ;;  %v2260_v41 = vld [vmem:[%s2455_s27 + $0x11c] sm:$0xf0]  ;;  %v1777_v43 = vld [vmem:[%s2455_s27 + $0x120] sm:$0xf0]  ;;  %v1847_v12 = vld [vmem:[%s2455_s27 + $0x188] sm:$0xf] }
  0x33   : > { %1224 = vmatmul.bf16.vlgmr.msra.gmra.mxu2 %v1656_v44  ;;  %1363 = vmatpush.bf16.msrb.mxu1 %v2207_v47  ;;  %v1783_v44 = vld [vmem:[%s2455_s27 + $0x108] sm:$0xf]  ;;  %v1785_v47 = vld [vmem:[%s2455_s27 + $0x128] sm:$0xf0]  ;;  %v2272_v10 = vld [vmem:[%s2455_s27 + $0x184] sm:$0xf] }
  0x34   : > { %1412 = vmatpush.bf16.msrb.mxu2 %v2215_v40  ;;  %1273 = vmatmul.bf16.vlgmr.msra.gmra.mxu3 %v1660_v45  ;;  %v1775_v40 = vld [vmem:[%s2455_s27 + $0x100] sm:$0xf]  ;;  %v2261_v45 = vld [vmem:[%s2455_s27 + $0x124] sm:$0xf0]  ;;  %v1841_v11 = vld [vmem:[%s2455_s27 + $0x1a0] sm:$0xf0] }
  0x35   : > { %1461 = vmatpush.bf16.msrb.mxu3 %v2223_v46  ;;  %v2257_v46 = vld [vmem:[%s2455_s27 + $0x10c] sm:$0xf]  ;;  %v2277_v13 = vld [vmem:[%s2455_s27 + $0x1a4] sm:$0xf0] }
  0x36   : > { %1315 = vmatpush.bf16.msrb.mxu0 %v2198_v49  ;;  %v1780_v49 = vor.u32 %v2256_v42, %v1777_v43  ;;  %v2273_v14 = vld [vmem:[%s2455_s27 + $0x18c] sm:$0xf]  ;;  %v1879_v24 = vld [vmem:[%s2455_s27 + $0x1c8] sm:$0xf] }
  0x37   : > { %1364 = vmatpush.bf16.msrb.mxu1 %v2206_v51  ;;  %v1788_v51 = vor.u32 %v2257_v46, %v1785_v47  ;;  %v1849_v15 = vld [vmem:[%s2455_s27 + $0x1a8] sm:$0xf0]  ;;  %v2285_v25 = vld [vmem:[%s2455_s27 + $0x1e4] sm:$0xf0] }
  0x38   : > { %1413 = vmatpush.bf16.msrb.mxu2 %v2214_v48  ;;  %v1776_v48 = vor.u32 %v2260_v41, %v1775_v40  ;;  %v2281_v26 = vld [vmem:[%s2455_s27 + $0x1cc] sm:$0xf]  ;;  %v1880_v30 = vor.u32 %v2285_v25, %v1879_v24 }
  0x39   : > { %1462 = vmatpush.bf16.msrb.mxu3 %v2222_v50  ;;  %v1784_v50 = vor.u32 %v2261_v45, %v1783_v44  ;;  %v1881_v27 = vld [vmem:[%s2455_s27 + $0x1e8] sm:$0xf0] }
  0x3a   : > { %1316 = vmatpush.bf16.msrb.mxu0 %v2197_v53  ;;  %v2193_v53 = vld [vmem:[%s2422_s19 + $0x108] sm:$0xff]  ;;  %v1884_v31 = vor.u32 %v2281_v26, %v1881_v27 }
  0x3b   : > { %1365 = vmatpush.bf16.msrb.mxu1 %v2205_v55  ;;  %v2201_v55 = vld [vmem:[%s2422_s19 + $0x148] sm:$0xff] }
  0x3c   : > { %1414 = vmatpush.bf16.msrb.mxu2 %v2213_v52  ;;  %v2209_v52 = vld [vmem:[%s2422_s19 + $0x188] sm:$0xff] }
  0x3d   : > { %1463 = vmatpush.bf16.msrb.mxu3 %v2221_v54  ;;  %v2217_v54 = vld [vmem:[%s2422_s19 + $0x1c8] sm:$0xff] }
  0x3e   : > { %1317 = vmatpush.bf16.msrb.mxu0 %v2196_v5  ;;  %v2192_v5 = vld [vmem:[%s2422_s19 + $0x100] sm:$0xff] }
  0x3f   : > { %1366 = vmatpush.bf16.msrb.mxu1 %v2204_v7  ;;  %v2200_v7 = vld [vmem:[%s2422_s19 + $0x140] sm:$0xff] }
  0x40   : > { %1415 = vmatpush.bf16.msrb.mxu2 %v2212_v4  ;;  %v2208_v4 = vld [vmem:[%s2422_s19 + $0x180] sm:$0xff] }
  0x41   : > { %1131 = vmatmul.bf16.gmra.mxu0 %v1680_v0  ;;  %1464 = vmatpush.bf16.msrb.mxu3 %v2220_v6  ;;  %v1808_v0 = vor.u32 %v2268_v57, %v1807_v56  ;;  %v2216_v6 = vld [vmem:[%s2422_s19 + $0x1c0] sm:$0xff]  ;;  %v2234_v56 = vld [vmem:[%s2455_s27 + $0x54] sm:$0xf] }
  0x42   : > { %1180 = vmatmul.bf16.gmra.mxu1 %v1684_v1  ;;  %1318 = vmatpush.bf16.msrb.mxu0 %v2195_v21  ;;  %v1812_v1 = vor.u32 %v2264_v58, %v1809_v59  ;;  %v2284_v21 = vld [vmem:[%s2455_s27 + $0x1dc] sm:$0xf0]  ;;  %v1697_v57 = vld [vmem:[%s2455_s27 + $0x70] sm:$0xf0]  ;;  %v1703_v58 = vld [vmem:[%s2455_s27 + $0x58] sm:$0xf] }
  0x43   : > { %1229 = vmatmul.bf16.gmra.mxu2 %v1688_v2  ;;  %1367 = vmatpush.bf16.msrb.mxu1 %v2203_v23  ;;  %v1816_v2 = vor.u32 %v2269_v61, %v1815_v60  ;;  %v1873_v23 = vld [vmem:[%s2455_s27 + $0x1e0] sm:$0xf0]  ;;  %v2239_v59 = vld [vmem:[%s2455_s27 + $0x74] sm:$0xf0]  ;;  %v2235_v60 = vld [vmem:[%s2455_s27 + $0x5c] sm:$0xf] }
  0x44   : > { %1278 = vmatmul.bf16.gmra.mxu3 %v1692_v3  ;;  %1416 = vmatpush.bf16.msrb.mxu2 %v2211_v20  ;;  %v1820_v3 = vor.u32 %v2265_v62, %v1817_v63  ;;  %v1871_v20 = vld [vmem:[%s2455_s27 + $0x1c0] sm:$0xf]  ;;  %v1705_v61 = vld [vmem:[%s2455_s27 + $0x78] sm:$0xf0] }
  0x45   : > { %1465 = vmatpush.bf16.msrb.mxu3 %v2219_v22  ;;  %v2280_v22 = vld [vmem:[%s2455_s27 + $0x1c4] sm:$0xf]  ;;  %v1872_v28 = vor.u32 %v2284_v21, %v1871_v20  ;;  %v1735_v20 = vld [vmem:[%s2455_s27 + $0x98] sm:$0xf] }
  0x46   : > { %1319 = vmatpush.bf16.msrb.mxu0 %v2194_v37  ;;  %v1876_v29 = vor.u32 %v2280_v22, %v1873_v23  ;;  %v2231_v37 = vld [vmem:[%s2455_s27 + $0x34] sm:$0xf0]  ;;  %v2243_v22 = vld [vmem:[%s2455_s27 + $0x9c] sm:$0xf] }
  0x47   : > { %1368 = vmatpush.bf16.msrb.mxu1 %v2202_v39  ;;  %v1673_v39 = vld [vmem:[%s2455_s27 + $0x38] sm:$0xf0]  ;;  %v2247_v21 = vld [vmem:[%s2455_s27 + $0xb4] sm:$0xf0] }
  0x48   : > { %1417 = vmatpush.bf16.msrb.mxu2 %v2210_v36  ;;  %v1671_v36 = vld [vmem:[%s2455_s27 + $0x18] sm:$0xf]  ;;  %v1737_v23 = vld [vmem:[%s2455_s27 + $0xb8] sm:$0xf0] }
  0x49   : > { %1466 = vmatpush.bf16.msrb.mxu3 %v2218_v38  ;;  %v2227_v38 = vld [vmem:[%s2455_s27 + $0x1c] sm:$0xf]  ;;  %v1672_v44 = vor.u32 %v2231_v37, %v1671_v36 }
  0x4a   : > { %1320 = vmatpush.bf16.msrb.mxu0 %v2193_v53  ;;  %v1676_v45 = vor.u32 %v2227_v38, %v1673_v39 }
  0x4b   : > { %1369 = vmatpush.bf16.msrb.mxu1 %v2201_v55  ;;  %v2238_v55 = vld [vmem:[%s2455_s27 + $0x6c] sm:$0xf0] }
  0x4c   : > { %1418 = vmatpush.bf16.msrb.mxu2 %v2209_v52 }
  0x4d   : > { %1467 = vmatpush.bf16.msrb.mxu3 %v2217_v54  ;;  %v1695_v54 = vld [vmem:[%s2455_s27 + $0x50] sm:$0xf] }
  0x4e   : > { %1321 = vmatpush.bf16.msrb.mxu0 %v2192_v5  ;;  %v1704_v5 = vor.u32 %v2239_v59, %v1703_v58 }
  0x4f   : > { %1370 = vmatpush.bf16.msrb.mxu1 %v2200_v7 }
  0x50   : > { %1419 = vmatpush.bf16.msrb.mxu2 %v2208_v4 }
  0x51   : > { %1136 = vmatmul.bf16.gmra.mxu0 %v1712_v16  ;;  %1468 = vmatpush.bf16.msrb.mxu3 %v2216_v6  ;;  %v1840_v16 = vor.u32 %v2276_v9, %v1839_v8  ;;  %v1708_v6 = vor.u32 %v2235_v60, %v1705_v61 }
  0x52   : > { %1185 = vmatmul.bf16.gmra.mxu1 %v1716_v17  ;;  %v1844_v17 = vor.u32 %v2272_v10, %v1841_v11 }
  0x53   : > { %1234 = vmatmul.bf16.gmra.mxu2 %v1720_v18  ;;  %v1848_v18 = vor.u32 %v2277_v13, %v1847_v12 }
  0x54   : > { %1283 = vmatmul.bf16.gmra.mxu3 %v1724_v19  ;;  %v1852_v19 = vor.u32 %v2273_v14, %v1849_v15 }
  0x61   : > { %1141 = vmatmul.bf16.gmra.mxu0 %v1744_v32  ;;  %v1663_v32 = vld [vmem:[%s2455_s27 + $0x10] sm:$0xf] }
  0x62   : > { %1190 = vmatmul.bf16.gmra.mxu1 %v1748_v33  ;;  %v2230_v33 = vld [vmem:[%s2455_s27 + $0x2c] sm:$0xf0] }
  0x63   : > { %1239 = vmatmul.bf16.gmra.mxu2 %v1752_v34  ;;  %v2226_v34 = vld [vmem:[%s2455_s27 + $0x14] sm:$0xf]  ;;  %v1664_v40 = vor.u32 %v2230_v33, %v1663_v32  ;;  %v1740_v32 = vor.u32 %v2243_v22, %v1737_v23 }
  0x64   : > { %1288 = vmatmul.bf16.gmra.mxu3 %v1756_v35  ;;  %v1665_v35 = vld [vmem:[%s2455_s27 + $0x30] sm:$0xf0] }
  0x65   : > { %v1668_v41 = vor.u32 %v2226_v34, %v1665_v35 }
  0x71   : > { %1146 = vmatmul.bf16.gmra.mxu0 %v1776_v48 }
  0x72   : > { %1195 = vmatmul.bf16.gmra.mxu1 %v1780_v49 }
  0x73   : > { %1244 = vmatmul.bf16.gmra.mxu2 %v1784_v50 }
  0x74   : > { %1293 = vmatmul.bf16.gmra.mxu3 %v1788_v51 }
  0x81   : > { %1151 = vmatmul.bf16.gmra.mxu0 %v1808_v0  ;;  %v1696_v0 = vor.u32 %v2238_v55, %v1695_v54 }
  0x82   : > { %1200 = vmatmul.bf16.gmra.mxu1 %v1812_v1  ;;  %v1700_v1 = vor.u32 %v2234_v56, %v1697_v57 }
  0x83   : > { %1249 = vmatmul.bf16.gmra.mxu2 %v1816_v2 }
  0x84   : > { %1298 = vmatmul.bf16.gmra.mxu3 %v1820_v3 }
  0x91   : > { %1156 = vmatmul.bf16.gmra.mxu0 %v1840_v16  ;;  %v1727_v16 = vld [vmem:[%s2455_s27 + $0x90] sm:$0xf] }
  0x92   : > { %1205 = vmatmul.bf16.gmra.mxu1 %v1844_v17  ;;  %v2246_v17 = vld [vmem:[%s2455_s27 + $0xac] sm:$0xf0] }
  0x93   : > { %1254 = vmatmul.bf16.gmra.mxu2 %v1848_v18  ;;  %v2242_v18 = vld [vmem:[%s2455_s27 + $0x94] sm:$0xf]  ;;  %v1728_v26 = vor.u32 %v2246_v17, %v1727_v16 }
  0x94   : > { %1303 = vmatmul.bf16.gmra.mxu3 %v1852_v19  ;;  %v1729_v19 = vld [vmem:[%s2455_s27 + $0xb0] sm:$0xf0] }
  0x95   : > { %v1732_v27 = vor.u32 %v2242_v18, %v1729_v19 }
  0xa1   : > { %1161 = vmatmul.bf16.gmra.mxu0 %v1872_v28 }
  0xa2   : > { %1210 = vmatmul.bf16.gmra.mxu1 %v1876_v29 }
  0xa3   : > { %1259 = vmatmul.bf16.gmra.mxu2 %v1880_v30 }
  0xa4   : > { %1308 = vmatmul.bf16.gmra.mxu3 %v1884_v31  ;;  %v1736_v31 = vor.u32 %v2247_v21, %v1735_v20 }
  0xae   : > { %v1127_v42 = vpop.f32.mrf.mxu0 }
  0xaf   : > { %v1176_v43 = vpop.f32.mrf.mxu1 }
  0xb0   : > { %v1177_v46 = vadd.f32 %v1176_v43, %v1127_v42  ;;  %v1759_v42 = vld [vmem:[%s2455_s27 + $0xd0] sm:$0xf] }
  0xb1   : > { %1322 = vmatmul.bf16.vlgmr.msrb.gmra.mxu0 %v1664_v40  ;;  %v2254_v43 = vld [vmem:[%s2455_s27 + $0xec] sm:$0xf0] }
  0xb2   : > { %1371 = vmatmul.bf16.vlgmr.msrb.gmra.mxu1 %v1668_v41 }
  0xb3   : > { %1420 = vmatmul.bf16.vlgmr.msrb.gmra.mxu2 %v1672_v44  ;;  %v2250_v44 = vld [vmem:[%s2455_s27 + $0xd4] sm:$0xf] }
  0xb4   : > { %1469 = vmatmul.bf16.vlgmr.msrb.gmra.mxu3 %v1676_v45  ;;  %v1761_v45 = vld [vmem:[%s2455_s27 + $0xf0] sm:$0xf0] }
  0xb5   : > { %v1764_v54 = vor.u32 %v2250_v44, %v1761_v45 }
  0xb6   : > { %v1225_v47 = vpop.f32.mrf.mxu2  ;;  %v1129_v50 = vpop.f32.mrf.mxu0 }
  0xb7   : > { %v1274_v48 = vpop.f32.mrf.mxu3  ;;  %v1226_v49 = vadd.f32 %v1225_v47, %v1177_v46  ;;  %v1178_v51 = vpop.f32.mrf.mxu1  ;;  %v1767_v46 = vld [vmem:[%s2455_s27 + $0xd8] sm:$0xf] }
  0xb8   : > { %v1179_v52 = vadd.f32 %v1178_v51, %v1129_v50  ;;  %v2255_v47 = vld [vmem:[%s2455_s27 + $0xf4] sm:$0xf0] }
  0xb9   : > { %v2567_v53 = vadd.f32 %v1274_v48, %v1226_v49  ;;  %v2251_v48 = vld [vmem:[%s2455_s27 + $0xdc] sm:$0xf]  ;;  %v1768_v58 = vor.u32 %v2255_v47, %v1767_v46 }
  0xba   : > { %v1769_v49 = vld [vmem:[%s2455_s27 + $0xf8] sm:$0xf0] }
  0xbb   : > { %v1772_v59 = vor.u32 %v2251_v48, %v1769_v49 }
  0xbe   : > { %v1227_v62 = vpop.f32.mrf.mxu2  ;;  %v1132_v3 = vpop.f32.mrf.mxu0 }
  0xbf   : > { %v1276_v63 = vpop.f32.mrf.mxu3  ;;  %v1228_v2 = vadd.f32 %v1227_v62, %v1179_v52  ;;  %v1181_v4 = vpop.f32.mrf.mxu1  ;;  %v1760_v52 = vor.u32 %v2254_v43, %v1759_v42  ;;  %v1833_v42 = vld [vmem:[%s2455_s27 + $0x178] sm:$0xf0] }
  0xc0   : > { %v1182_v7 = vadd.f32 %v1181_v4, %v1132_v3 }
  0xc1   : > { %v2577_v8 = vadd.f32 %v1276_v63, %v1228_v2  ;;  %1327 = vmatmul.bf16.gmra.mxu0 %v1696_v0 }
  0xc2   : > { %1376 = vmatmul.bf16.gmra.mxu1 %v1700_v1 }
  0xc3   : > { %1425 = vmatmul.bf16.gmra.mxu2 %v1704_v5  ;;  %v1791_v5 = vld [vmem:[%s2455_s27 + $0x110] sm:$0xf] }
  0xc4   : > { %1474 = vmatmul.bf16.gmra.mxu3 %v1708_v6  ;;  %v2262_v6 = vld [vmem:[%s2455_s27 + $0x12c] sm:$0xf0] }
  0xc5   : > { %v1792_v17 = vor.u32 %v2262_v6, %v1791_v5  ;;  %v2279_v5 = vld [vmem:[%s2455_s27 + $0x1b4] sm:$0xf0]  ;;  %v2275_v6 = vld [vmem:[%s2455_s27 + $0x19c] sm:$0xf] }
  0xc6   : > { %v1230_v9 = vpop.f32.mrf.mxu2  ;;  %v1134_v12 = vpop.f32.mrf.mxu0 }
  0xc7   : > { %v1279_v10 = vpop.f32.mrf.mxu3  ;;  %v1231_v11 = vadd.f32 %v1230_v9, %v1182_v7  ;;  %v1183_v13 = vpop.f32.mrf.mxu1  ;;  %v2258_v7 = vld [vmem:[%s2455_s27 + $0x114] sm:$0xf] }
  0xc8   : > { %v1184_v14 = vadd.f32 %v1183_v13, %v1134_v12  ;;  %v1793_v9 = vld [vmem:[%s2455_s27 + $0x130] sm:$0xf0]  ;;  %v2259_v12 = vld [vmem:[%s2455_s27 + $0x11c] sm:$0xf] }
  0xc9   : > { %v2579_v15 = vadd.f32 %v1279_v10, %v1231_v11  ;;  %v1799_v10 = vld [vmem:[%s2455_s27 + $0x118] sm:$0xf]  ;;  %v1801_v13 = vld [vmem:[%s2455_s27 + $0x138] sm:$0xf0]  ;;  %v1796_v18 = vor.u32 %v2258_v7, %v1793_v9 }
  0xca   : > { %v2263_v11 = vld [vmem:[%s2455_s27 + $0x134] sm:$0xf0]  ;;  %v1804_v23 = vor.u32 %v2259_v12, %v1801_v13  ;;  %v1865_v7 = vld [vmem:[%s2455_s27 + $0x1b8] sm:$0xf0] }
  0xcb   : > { %v1800_v22 = vor.u32 %v2263_v11, %v1799_v10 }
  0xce   : > { %v1232_v24 = vpop.f32.mrf.mxu2  ;;  %v1137_v29 = vpop.f32.mrf.mxu0 }
  0xcf   : > { %v1281_v25 = vpop.f32.mrf.mxu3  ;;  %v1233_v28 = vadd.f32 %v1232_v24, %v1184_v14  ;;  %v1186_v30 = vpop.f32.mrf.mxu1 }
  0xd0   : > { %v1187_v33 = vadd.f32 %v1186_v30, %v1137_v29 }
  0xd1   : > { %v2589_v34 = vadd.f32 %v1281_v25, %v1233_v28  ;;  %1332 = vmatmul.bf16.gmra.mxu0 %v1728_v26 }
  0xd2   : > { %1381 = vmatmul.bf16.gmra.mxu1 %v1732_v27 }
  0xd3   : > { %1430 = vmatmul.bf16.gmra.mxu2 %v1736_v31 }
  0xd4   : > { %1479 = vmatmul.bf16.gmra.mxu3 %v1740_v32 }
  0xd6   : > { %v1235_v35 = vpop.f32.mrf.mxu2  ;;  %v1139_v38 = vpop.f32.mrf.mxu0 }
  0xd7   : > { %v1284_v36 = vpop.f32.mrf.mxu3  ;;  %v1236_v37 = vadd.f32 %v1235_v35, %v1187_v33  ;;  %v1188_v39 = vpop.f32.mrf.mxu1  ;;  %v1823_v33 = vld [vmem:[%s2455_s27 + $0x150] sm:$0xf] }
  0xd8   : > { %v1189_v40 = vadd.f32 %v1188_v39, %v1139_v38  ;;  %v2270_v35 = vld [vmem:[%s2455_s27 + $0x16c] sm:$0xf0]  ;;  %v1831_v38 = vld [vmem:[%s2455_s27 + $0x158] sm:$0xf] }
  0xd9   : > { %v2591_v41 = vadd.f32 %v1284_v36, %v1236_v37  ;;  %v2266_v36 = vld [vmem:[%s2455_s27 + $0x154] sm:$0xf]  ;;  %v2271_v39 = vld [vmem:[%s2455_s27 + $0x174] sm:$0xf0]  ;;  %v1824_v45 = vor.u32 %v2270_v35, %v1823_v33 }
  0xda   : > { %v1825_v37 = vld [vmem:[%s2455_s27 + $0x170] sm:$0xf0]  ;;  %v1895_v35 = vld [vmem:[%s2455_s27 + $0x1d8] sm:$0xf] }
  0xdb   : > { %v1828_v46 = vor.u32 %v2266_v36, %v1825_v37  ;;  %v1889_v33 = vld [vmem:[%s2455_s27 + $0x1f0] sm:$0xf0]  ;;  %v2287_v36 = vld [vmem:[%s2455_s27 + $0x1f4] sm:$0xf0]  ;;  %v2283_v37 = vld [vmem:[%s2455_s27 + $0x1dc] sm:$0xf] }
  0xde   : > { %v1237_v50 = vpop.f32.mrf.mxu2  ;;  %v1142_v56 = vpop.f32.mrf.mxu0 }
  0xdf   : > { %v1286_v51 = vpop.f32.mrf.mxu3  ;;  %v1238_v55 = vadd.f32 %v1237_v50, %v1189_v40  ;;  %v1191_v57 = vpop.f32.mrf.mxu1  ;;  %v2267_v40 = vld [vmem:[%s2455_s27 + $0x15c] sm:$0xf]  ;;  %v1832_v50 = vor.u32 %v2271_v39, %v1831_v38 }
  0xe0   : > { %v1192_v60 = vadd.f32 %v1191_v57, %v1142_v56  ;;  %v1897_v38 = vld [vmem:[%s2455_s27 + $0x1f8] sm:$0xf0] }
  0xe1   : > { %v2601_v61 = vadd.f32 %v1286_v51, %v1238_v55  ;;  %1337 = vmatmul.bf16.gmra.mxu0 %v1760_v52  ;;  %v1836_v51 = vor.u32 %v2267_v40, %v1833_v42 }
  0xe2   : > { %1386 = vmatmul.bf16.gmra.mxu1 %v1764_v54 }
  0xe3   : > { %1435 = vmatmul.bf16.gmra.mxu2 %v1768_v58 }
  0xe4   : > { %1484 = vmatmul.bf16.gmra.mxu3 %v1772_v59 }
  0xe6   : > { %v1240_v62 = vpop.f32.mrf.mxu2  ;;  %v1144_v1 = vpop.f32.mrf.mxu0 }
  0xe7   : > { %v1289_v63 = vpop.f32.mrf.mxu3  ;;  %v1241_v0 = vadd.f32 %v1240_v62, %v1192_v60  ;;  %v1193_v2 = vpop.f32.mrf.mxu1 }
  0xe8   : > { %v1194_v3 = vadd.f32 %v1193_v2, %v1144_v1  ;;  %v2274_v1 = vld [vmem:[%s2455_s27 + $0x194] sm:$0xf] }
  0xe9   : > { %v2603_v4 = vadd.f32 %v1289_v63, %v1241_v0  ;;  %v1855_v63 = vld [vmem:[%s2455_s27 + $0x190] sm:$0xf]  ;;  %v1857_v2 = vld [vmem:[%s2455_s27 + $0x1b0] sm:$0xf0] }
  0xea   : > { %v2278_v0 = vld [vmem:[%s2455_s27 + $0x1ac] sm:$0xf0]  ;;  %v1860_v12 = vor.u32 %v2274_v1, %v1857_v2 }
  0xeb   : > { %v1856_v11 = vor.u32 %v2278_v0, %v1855_v63 }
  0xee   : > { %v1242_v14 = vpop.f32.mrf.mxu2  ;;  %v1147_v20 = vpop.f32.mrf.mxu0 }
  0xef   : > { %v1291_v16 = vpop.f32.mrf.mxu3  ;;  %v1243_v19 = vadd.f32 %v1242_v14, %v1194_v3  ;;  %v1196_v21 = vpop.f32.mrf.mxu1  ;;  %v1863_v3 = vld [vmem:[%s2455_s27 + $0x198] sm:$0xf] }
  0xf0   : > { %v1197_v24 = vadd.f32 %v1196_v21, %v1147_v20 }
  0xf1   : > { %v2613_v25 = vadd.f32 %v1291_v16, %v1243_v19  ;;  %1342 = vmatmul.bf16.gmra.mxu0 %v1792_v17  ;;  %v1864_v17 = vor.u32 %v2279_v5, %v1863_v3 }
  0xf2   : > { %1391 = vmatmul.bf16.gmra.mxu1 %v1796_v18  ;;  %v1868_v18 = vor.u32 %v2275_v6, %v1865_v7 }
  0xf3   : > { %1440 = vmatmul.bf16.gmra.mxu2 %v1800_v22 }
  0xf4   : > { %1489 = vmatmul.bf16.gmra.mxu3 %v1804_v23 }
  0xf6   : > { %v1245_v26 = vpop.f32.mrf.mxu2  ;;  %v1149_v29 = vpop.f32.mrf.mxu0 }
  0xf7   : > { %v1294_v27 = vpop.f32.mrf.mxu3  ;;  %v1246_v28 = vadd.f32 %v1245_v26, %v1197_v24  ;;  %v1198_v30 = vpop.f32.mrf.mxu1 }
  0xf8   : > { %v1199_v31 = vadd.f32 %v1198_v30, %v1149_v29  ;;  %v1887_v29 = vld [vmem:[%s2455_s27 + $0x1d0] sm:$0xf] }
  0xf9   : > { %v2615_v32 = vadd.f32 %v1294_v27, %v1246_v28  ;;  %v2286_v30 = vld [vmem:[%s2455_s27 + $0x1ec] sm:$0xf0] }
  0xfa   : > { %v1888_v42 = vor.u32 %v2286_v30, %v1887_v29 }
  0xfe   : > { %v1247_v43 = vpop.f32.mrf.mxu2  ;;  %v1152_v48 = vpop.f32.mrf.mxu0 }
  0xff   : > { %v1296_v44 = vpop.f32.mrf.mxu3  ;;  %v1248_v47 = vadd.f32 %v1247_v43, %v1199_v31  ;;  %v1201_v49 = vpop.f32.mrf.mxu1  ;;  %v2282_v31 = vld [vmem:[%s2455_s27 + $0x1d4] sm:$0xf] }
 0x100   : > { %v1202_v52 = vadd.f32 %v1201_v49, %v1152_v48  ;;  %v1892_v43 = vor.u32 %v2282_v31, %v1889_v33  ;;  %v1900_v48 = vor.u32 %v2283_v37, %v1897_v38 }
 0x101   : > { %v2625_v54 = vadd.f32 %v1296_v44, %v1248_v47  ;;  %1347 = vmatmul.bf16.gmra.mxu0 %v1824_v45  ;;  %v1896_v47 = vor.u32 %v2287_v36, %v1895_v35 }
 0x102   : > { %1396 = vmatmul.bf16.gmra.mxu1 %v1828_v46 }
 0x103   : > { %1445 = vmatmul.bf16.gmra.mxu2 %v1832_v50 }
 0x104   : > { %1494 = vmatmul.bf16.gmra.mxu3 %v1836_v51 }
 0x106   : > { %v1250_v55 = vpop.f32.mrf.mxu2  ;;  %v1154_v58 = vpop.f32.mrf.mxu0 }
 0x107   : > { %v1299_v56 = vpop.f32.mrf.mxu3  ;;  %v1251_v57 = vadd.f32 %v1250_v55, %v1202_v52  ;;  %v1203_v59 = vpop.f32.mrf.mxu1 }
 0x108   : > { %v1204_v60 = vadd.f32 %v1203_v59, %v1154_v58 }
 0x109   : > { %v2627_v62 = vadd.f32 %v1299_v56, %v1251_v57 }
 0x10e   : > { %v1252_v9 = vpop.f32.mrf.mxu2  ;;  %v1157_v14 = vpop.f32.mrf.mxu0 }
 0x10f   : > { %v1301_v10 = vpop.f32.mrf.mxu3  ;;  %v1253_v13 = vadd.f32 %v1252_v9, %v1204_v60  ;;  %v1206_v16 = vpop.f32.mrf.mxu1 }
 0x110   : > { %v1207_v19 = vadd.f32 %v1206_v16, %v1157_v14 }
 0x111   : > { %v2637_v20 = vadd.f32 %v1301_v10, %v1253_v13  ;;  %1352 = vmatmul.bf16.gmra.mxu0 %v1856_v11 }
 0x112   : > { %1401 = vmatmul.bf16.gmra.mxu1 %v1860_v12 }
 0x113   : > { %1450 = vmatmul.bf16.gmra.mxu2 %v1864_v17 }
 0x114   : > { %1499 = vmatmul.bf16.gmra.mxu3 %v1868_v18 }
 0x116   : > { %v1255_v21 = vpop.f32.mrf.mxu2  ;;  %v1159_v24 = vpop.f32.mrf.mxu0 }
 0x117   : > { %v1304_v22 = vpop.f32.mrf.mxu3  ;;  %v1256_v23 = vadd.f32 %v1255_v21, %v1207_v19  ;;  %v1208_v26 = vpop.f32.mrf.mxu1 }
 0x118   : > { %v1209_v27 = vadd.f32 %v1208_v26, %v1159_v24 }
 0x119   : > { %v2639_v28 = vadd.f32 %v1304_v22, %v1256_v23 }
 0x11e   : > { %v1257_v39 = vpop.f32.mrf.mxu2  ;;  %v1162_v45 = vpop.f32.mrf.mxu0 }
 0x11f   : > { %v1306_v40 = vpop.f32.mrf.mxu3  ;;  %v1258_v44 = vadd.f32 %v1257_v39, %v1209_v27  ;;  %v1211_v46 = vpop.f32.mrf.mxu1 }
 0x120   : > { %v1212_v49 = vadd.f32 %v1211_v46, %v1162_v45 }
 0x121   : > { %v2649_v50 = vadd.f32 %v1306_v40, %v1258_v44  ;;  %1357 = vmatmul.bf16.gmra.mxu0 %v1888_v42 }
 0x122   : > { %1406 = vmatmul.bf16.gmra.mxu1 %v1892_v43 }
 0x123   : > { %1455 = vmatmul.bf16.gmra.mxu2 %v1896_v47 }
 0x124   : > { %1504 = vmatmul.bf16.gmra.mxu3 %v1900_v48 }
 0x126   : > { %v1260_v51 = vpop.f32.mrf.mxu2  ;;  %v1164_v56 = vpop.f32.mrf.mxu0 }
 0x127   : > { %v1309_v52 = vpop.f32.mrf.mxu3  ;;  %v1261_v55 = vadd.f32 %v1260_v51, %v1212_v49  ;;  %v1213_v57 = vpop.f32.mrf.mxu1 }
 0x128   : > { %v1214_v58 = vadd.f32 %v1213_v57, %v1164_v56 }
 0x129   : > { %v2651_v59 = vadd.f32 %v1309_v52, %v1261_v55 }
 0x12e   : > { %v1262_v60 = vpop.f32.mrf.mxu2  ;;  %v1323_v1 = vpop.f32.mrf.mxu0 }
 0x12f   : > { %v1311_v63 = vpop.f32.mrf.mxu3  ;;  %v1263_v0 = vadd.f32 %v1262_v60, %v1214_v58  ;;  %v1372_v2 = vpop.f32.mrf.mxu1  ;;  %v1324_v3 = vadd.f32 %v1323_v1, %v2567_v53 }
 0x131   : > { %v2654_v5 = vadd.f32 %v1311_v63, %v1263_v0  ;;  %v1373_v6 = vadd.f32 %v1372_v2, %v1324_v3 }
 0x136   : > { %v1421_v7 = vpop.f32.mrf.mxu2  ;;  %v1325_v11 = vpop.f32.mrf.mxu0 }
 0x137   : > { %v1470_v9 = vpop.f32.mrf.mxu3  ;;  %v1422_v10 = vadd.f32 %v1421_v7, %v1373_v6  ;;  %v1374_v12 = vpop.f32.mrf.mxu1  ;;  %v1326_v13 = vadd.f32 %v1325_v11, %v2577_v8 }
 0x139   : > { %v2657_v14 = vadd.f32 %v1470_v9, %v1422_v10  ;;  %v1375_v16 = vadd.f32 %v1374_v12, %v1326_v13 }
 0x13e   : > { %v1423_v17 = vpop.f32.mrf.mxu2  ;;  %v1328_v21 = vpop.f32.mrf.mxu0 }
 0x13f   : > { %v1472_v18 = vpop.f32.mrf.mxu3  ;;  %v1424_v19 = vadd.f32 %v1423_v17, %v1375_v16  ;;  %v1377_v22 = vpop.f32.mrf.mxu1  ;;  %v1329_v53 = vadd.f32 %v1328_v21, %v2579_v15 }
 0x141   : > { %v2660_v23 = vadd.f32 %v1472_v18, %v1424_v19  ;;  %v1378_v24 = vadd.f32 %v1377_v22, %v1329_v53 }
 0x146   : > { %v1426_v26 = vpop.f32.mrf.mxu2  ;;  %v1330_v30 = vpop.f32.mrf.mxu0 }
 0x147   : > { %v1475_v27 = vpop.f32.mrf.mxu3  ;;  %v1427_v29 = vadd.f32 %v1426_v26, %v1378_v24  ;;  %v1379_v31 = vpop.f32.mrf.mxu1  ;;  %v1331_v8 = vadd.f32 %v1330_v30, %v2589_v34 }
 0x149   : > { %v2663_v33 = vadd.f32 %v1475_v27, %v1427_v29  ;;  %v1380_v35 = vadd.f32 %v1379_v31, %v1331_v8 }
 0x14e   : > { %v1428_v36 = vpop.f32.mrf.mxu2  ;;  %v1333_v39 = vpop.f32.mrf.mxu0 }
 0x14f   : > { %v1477_v37 = vpop.f32.mrf.mxu3  ;;  %v1429_v38 = vadd.f32 %v1428_v36, %v1380_v35  ;;  %v1382_v40 = vpop.f32.mrf.mxu1  ;;  %v1334_v15 = vadd.f32 %v1333_v39, %v2591_v41 }
 0x151   : > { %v2666_v42 = vadd.f32 %v1477_v37, %v1429_v38  ;;  %v1383_v43 = vadd.f32 %v1382_v40, %v1334_v15 }
 0x156   : > { %v1431_v44 = vpop.f32.mrf.mxu2  ;;  %v1335_v47 = vpop.f32.mrf.mxu0 }
 0x157   : > { %v1480_v45 = vpop.f32.mrf.mxu3  ;;  %v1432_v46 = vadd.f32 %v1431_v44, %v1383_v43  ;;  %v1384_v48 = vpop.f32.mrf.mxu1  ;;  %v1336_v34 = vadd.f32 %v1335_v47, %v2601_v61 }
 0x159   : > { %v1481_v49 = vadd.f32 %v1480_v45, %v1432_v46  ;;  %v1385_v51 = vadd.f32 %v1384_v48, %v1336_v34 }
 0x15b   : > { %v1510_v52 = vmax.f32 %v2657_v14, %v1481_v49 }
 0x15e   : > { %v1433_v55 = vpop.f32.mrf.mxu2  ;;  %v1338_v58 = vpop.f32.mrf.mxu0 }
 0x15f   : > { %v1482_v56 = vpop.f32.mrf.mxu3  ;;  %v1434_v57 = vadd.f32 %v1433_v55, %v1385_v51  ;;  %v1387_v60 = vpop.f32.mrf.mxu1  ;;  %v1339_v41 = vadd.f32 %v1338_v58, %v2603_v4 }
 0x161   : > { %v1483_v63 = vadd.f32 %v1482_v56, %v1434_v57  ;;  %v1388_v0 = vadd.f32 %v1387_v60, %v1339_v41 }
 0x163   : > { %v1511_v1 = vmax.f32 %v2660_v23, %v1483_v63 }
 0x166   : > { %v1436_v2 = vpop.f32.mrf.mxu2  ;;  %v1340_v7 = vpop.f32.mrf.mxu0 }
 0x167   : > { %v1485_v3 = vpop.f32.mrf.mxu3  ;;  %v1437_v6 = vadd.f32 %v1436_v2, %v1388_v0  ;;  %v1389_v61 = vpop.f32.mrf.mxu1  ;;  %v1341_v10 = vadd.f32 %v1340_v7, %v2613_v25 }
 0x169   : > { %v1486_v9 = vadd.f32 %v1485_v3, %v1437_v6  ;;  %v1390_v12 = vadd.f32 %v1389_v61, %v1341_v10 }
 0x16b   : > { %v1512_v11 = vmax.f32 %v2663_v33, %v1486_v9 }
 0x16e   : > { %v1438_v13 = vpop.f32.mrf.mxu2  ;;  %v1343_v17 = vpop.f32.mrf.mxu0 }
 0x16f   : > { %v1487_v14 = vpop.f32.mrf.mxu3  ;;  %v1439_v16 = vadd.f32 %v1438_v13, %v1390_v12  ;;  %v1392_v4 = vpop.f32.mrf.mxu1  ;;  %v1344_v19 = vadd.f32 %v1343_v17, %v2615_v32 }
 0x171   : > { %v1488_v18 = vadd.f32 %v1487_v14, %v1439_v16  ;;  %v1393_v22 = vadd.f32 %v1392_v4, %v1344_v19 }
 0x173   : > { %v1513_v21 = vmax.f32 %v2666_v42, %v1488_v18 }
 0x176   : > { %v1441_v53 = vpop.f32.mrf.mxu2  ;;  %v1345_v26 = vpop.f32.mrf.mxu0 }
 0x177   : > { %v1490_v23 = vpop.f32.mrf.mxu3  ;;  %v1442_v24 = vadd.f32 %v1441_v53, %v1393_v22  ;;  %v1394_v27 = vpop.f32.mrf.mxu1  ;;  %v1346_v29 = vadd.f32 %v1345_v26, %v2625_v54 }
 0x179   : > { %v1491_v25 = vadd.f32 %v1490_v23, %v1442_v24  ;;  %v1395_v31 = vadd.f32 %v1394_v27, %v1346_v29 }
 0x17b   : > { %v1514_v30 = vmax.f32 %v1510_v52, %v1491_v25 }
 0x17e   : > { %v1443_v8 = vpop.f32.mrf.mxu2  ;;  %v1348_v36 = vpop.f32.mrf.mxu0 }
 0x17f   : > { %v1492_v33 = vpop.f32.mrf.mxu3  ;;  %v1444_v35 = vadd.f32 %v1443_v8, %v1395_v31  ;;  %v1397_v37 = vpop.f32.mrf.mxu1  ;;  %v1349_v32 = vadd.f32 %v1348_v36, %v2627_v62 }
 0x181   : > { %v1493_v38 = vadd.f32 %v1492_v33, %v1444_v35  ;;  %v1398_v40 = vadd.f32 %v1397_v37, %v1349_v32 }
 0x183   : > { %v1515_v39 = vmax.f32 %v1511_v1, %v1493_v38 }
 0x186   : > { %v1446_v15 = vpop.f32.mrf.mxu2  ;;  %v1350_v44 = vpop.f32.mrf.mxu0 }
 0x187   : > { %v1495_v42 = vpop.f32.mrf.mxu3  ;;  %v1447_v43 = vadd.f32 %v1446_v15, %v1398_v40  ;;  %v1399_v45 = vpop.f32.mrf.mxu1  ;;  %v1351_v54 = vadd.f32 %v1350_v44, %v2637_v20 }
 0x189   : > { %v1496_v46 = vadd.f32 %v1495_v42, %v1447_v43  ;;  %v1400_v48 = vadd.f32 %v1399_v45, %v1351_v54 }
 0x18b   : > { %v1516_v47 = vmax.f32 %v1512_v11, %v1496_v46 }
 0x18e   : > { %v1448_v34 = vpop.f32.mrf.mxu2  ;;  %v1353_v52 = vpop.f32.mrf.mxu0 }
 0x18f   : > { %v1497_v49 = vpop.f32.mrf.mxu3  ;;  %v1449_v51 = vadd.f32 %v1448_v34, %v1400_v48  ;;  %v1402_v55 = vpop.f32.mrf.mxu1  ;;  %v1354_v62 = vadd.f32 %v1353_v52, %v2639_v28 }
 0x191   : > { %v1498_v56 = vadd.f32 %v1497_v49, %v1449_v51  ;;  %v1403_v58 = vadd.f32 %v1402_v55, %v1354_v62 }
 0x193   : > { %v1517_v57 = vmax.f32 %v1513_v21, %v1498_v56 }
 0x196   : > { %v1451_v60 = vpop.f32.mrf.mxu2  ;;  %v1355_v0 = vpop.f32.mrf.mxu0 }
 0x197   : > { %v1500_v41 = vpop.f32.mrf.mxu3  ;;  %v1452_v63 = vadd.f32 %v1451_v60, %v1403_v58  ;;  %v1404_v1 = vpop.f32.mrf.mxu1  ;;  %v1356_v20 = vadd.f32 %v1355_v0, %v2649_v50 }
 0x199   : > { %v1501_v2 = vadd.f32 %v1500_v41, %v1452_v63  ;;  %v1405_v6 = vadd.f32 %v1404_v1, %v1356_v20 }
 0x19b   : > { %v1518_v3 = vmax.f32 %v1514_v30, %v1501_v2 }
 0x19e   : > { %v1453_v7 = vpop.f32.mrf.mxu2  ;;  %v1358_v10 = vpop.f32.mrf.mxu0 }
 0x19f   : > { %v1502_v61 = vpop.f32.mrf.mxu3  ;;  %v1454_v9 = vadd.f32 %v1453_v7, %v1405_v6  ;;  %v1359_v28 = vadd.f32 %v1358_v10, %v2651_v59  ;;  %v1407_v12 = vpop.f32.mrf.mxu1 }
 0x1a1   : > { %v1503_v11 = vadd.f32 %v1502_v61, %v1454_v9  ;;  %v1408_v16 = vadd.f32 %v1407_v12, %v1359_v28 }
 0x1a3   : > { %v1519_v13 = vmax.f32 %v1515_v39, %v1503_v11 }
 0x1a5   : > { %v1522_v14 = vmax.f32 %v1518_v3, %v1519_v13 }
 0x1a6   : > { %v1456_v17 = vpop.f32.mrf.mxu2  ;;  %v1360_v50 = vpop.f32.mrf.mxu0 }
 0x1a7   : > { %v1505_v4 = vpop.f32.mrf.mxu3  ;;  %v1457_v18 = vadd.f32 %v1456_v17, %v1408_v16  ;;  %v1361_v21 = vadd.f32 %v1360_v50, %v2654_v5  ;;  %v1409_v53 = vpop.f32.mrf.mxu1 }
 0x1a9   : > { %v1506_v19 = vadd.f32 %v1505_v4, %v1457_v18  ;;  %v1410_v23 = vadd.f32 %v1409_v53, %v1361_v21 }
 0x1ab   : > { %v1520_v22 = vmax.f32 %v1516_v47, %v1506_v19 }
 0x1ae   : > { %v1458_v24 = vpop.f32.mrf.mxu2 }
 0x1af   : > { %v1459_v26 = vadd.f32 %v1458_v24, %v1410_v23  ;;  %v1507_v59 = vpop.f32.mrf.mxu3 }
 0x1b1   : > { %v1508_v27 = vadd.f32 %v1507_v59, %v1459_v26 }
 0x1b3   : > { %v1521_v25 = vmax.f32 %v1517_v57, %v1508_v27 }
 0x1b5   : > { %v1523_v29 = vmax.f32 %v1520_v22, %v1521_v25 }
 0x1b7   : > { %v1524_v30 = vmax.f32 %v1522_v14, %v1523_v29 }
 0x1b9   : > { %1527 = vst [vmem:[%s216_s5] sm:$0xff] %v1524_v30 }
 0x1ba PF: > { %s12_s13 = sadd.s32 1, %s2367_s13   ;;  %s2707_s9 = smov %s2359_s11 }
 0x1bb   : > { %p9_p8 = scmp.ge.s32.totalorder %s12_s13, 6   ;;  %s2708_s10 = smov %s2363_s12 }
 0x1bc   : > { %s2709_s11 = smov %s2712_s14  ;;  %s2710_s12 = smov %s2716_s15 }
 0x1bd   :  { %11 = sbr.rel (!%p9_p8) target bundleno = 3 (0x3), region = 65 }

// kernel: forward.3
= control target key start
LH: loop header
LB: loop body
LE: loop exit
PB: predicated region body
PF: predicated region fallthrough
CT: control target
= control target key end

     0   :  { %s3305_s9 = smov 0   ;;  %s3307_s10 = smov 0   ;;  %s3933_s0 = inlined_call_operand.vmem [shape: bf16[1,1536,128], index: 0, kind: input, shape index: {}]   ;;  %s3934_s1 = inlined_call_operand.vmem [shape: bf16[1,256,1536], index: 1, kind: input, shape index: {}]   ;;  %s3935_s2 = inlined_call_operand.vmem [shape: f32[2,1,8,128], index: 2, kind: output, shape index: {}]  }
   0x1   :  { %s3309_s11 = smov 0  }
   0x2 LB: > { %s31_s12 = sadd.s32 1, %s3284_s10  ;;  %p2274_p0 = scmp.ge.s32.totalorder %s3288_s11, 1  ;;  %s3288_s11 = sphi %s3309_s11, %s12_s11   ;;  %s3284_s10 = sphi %s3307_s10, %s3937_s10   ;;  %s3280_s9 = sphi %s3305_s9, %s3936_s9  }
   0x3   : > { %p33_p1 = scmp.ge.s32.totalorder %s31_s12, 2  ;;  %p155_p2 = scmp.lt.s32.totalorder %s3288_s11, 3 }
   0x5   : > { %s3939_s12 = smov (%p33_p1, %s31_s12), 0  ;;  %p156_p3 = pnand %p2274_p0, %p155_p2 }
   0x6   : > { %s2275_s13 = sshll.u32 (!%p156_p3), %s3280_s9, 4  ;;  %p208_p5 = scmp.lt.s32.totalorder (!%p156_p3), %s3280_s9, 1 }
   0x7   : > { %159 = sbr.rel (%p156_p3) target bundleno = 565 (0x235), region = 28  ;;  %p199_p4 = scmp.lt.s32.totalorder (!%p156_p3), %s2275_s13, 31 }
   0xc   : > { %v3055_v0 = vld [vmem:[%s3933_s0 + $0x38] sm:$0xff]  ;;  %v3054_v4 = vld [vmem:[%s3933_s0 + $0x30] sm:$0xff]  ;;  %v3053_v8 = vld [vmem:[%s3933_s0 + $0x28] sm:$0xff]  ;;  %s3941_s13 = smov (!%p199_p4, %s2275_s13), 31  ;;  %s3943_s9 = smov (!%p208_p5, %s3280_s9), 1 }
   0xd   : > { %v3063_v1 = vld [vmem:[%s3933_s0 + $0x78] sm:$0xff]  ;;  %1564 = vmatpush.bf16.msra.mxu0 %v3055_v0  ;;  %v3062_v5 = vld [vmem:[%s3933_s0 + $0x70] sm:$0xff]  ;;  %v3061_v9 = vld [vmem:[%s3933_s0 + $0x68] sm:$0xff]  ;;  %s3240_s6 = smul.u32 48, %s3941_s13 }
   0xe   : > { %v3071_v2 = vld [vmem:[%s3933_s0 + $0xb8] sm:$0xff]  ;;  %1613 = vmatpush.bf16.msra.mxu1 %v3063_v1  ;;  %v3070_v6 = vld [vmem:[%s3933_s0 + $0xb0] sm:$0xff]  ;;  %v3069_v10 = vld [vmem:[%s3933_s0 + $0xa8] sm:$0xff] }
   0xf   : > { %v3079_v3 = vld [vmem:[%s3933_s0 + $0xf8] sm:$0xff]  ;;  %1662 = vmatpush.bf16.msra.mxu2 %v3071_v2  ;;  %v3078_v7 = vld [vmem:[%s3933_s0 + $0xf0] sm:$0xff]  ;;  %v3077_v11 = vld [vmem:[%s3933_s0 + $0xe8] sm:$0xff]  ;;  %s3407_s21 = scalar_lea.vmem %s3934_s1, %s3240_s6 }
  0x10   : > { %1711 = vmatpush.bf16.msra.mxu3 %v3079_v3  ;;  %v3052_v12 = vld [vmem:[%s3933_s0 + $0x20] sm:$0xff]  ;;  %v3051_v16 = vld [vmem:[%s3933_s0 + $0x18] sm:$0xff]  ;;  %v3050_v20 = vld [vmem:[%s3933_s0 + $0x10] sm:$0xff] }
  0x11   : > { %1565 = vmatpush.bf16.msra.mxu0 %v3054_v4  ;;  %v3060_v13 = vld [vmem:[%s3933_s0 + $0x60] sm:$0xff]  ;;  %v3059_v17 = vld [vmem:[%s3933_s0 + $0x58] sm:$0xff]  ;;  %v3058_v21 = vld [vmem:[%s3933_s0 + $0x50] sm:$0xff] }
  0x12   : > { %1614 = vmatpush.bf16.msra.mxu1 %v3062_v5  ;;  %v3068_v14 = vld [vmem:[%s3933_s0 + $0xa0] sm:$0xff]  ;;  %v3067_v18 = vld [vmem:[%s3933_s0 + $0x98] sm:$0xff]  ;;  %v3066_v22 = vld [vmem:[%s3933_s0 + $0x90] sm:$0xff] }
  0x13   : > { %1663 = vmatpush.bf16.msra.mxu2 %v3070_v6  ;;  %v3076_v15 = vld [vmem:[%s3933_s0 + $0xe0] sm:$0xff]  ;;  %v3075_v19 = vld [vmem:[%s3933_s0 + $0xd8] sm:$0xff]  ;;  %v3074_v23 = vld [vmem:[%s3933_s0 + $0xd0] sm:$0xff] }
  0x14   : > { %1712 = vmatpush.bf16.msra.mxu3 %v3078_v7  ;;  %v3049_v24 = vld [vmem:[%s3933_s0 + $0x8] sm:$0xff]  ;;  %v3048_v28 = vld [vmem:[%s3933_s0] sm:$0xff]  ;;  %v3150_v33 = vld [vmem:[%s3407_s21 + $0x2c] sm:$0xf0] }
  0x15   : > { %1566 = vmatpush.bf16.msra.mxu0 %v3053_v8  ;;  %v3057_v25 = vld [vmem:[%s3933_s0 + $0x48] sm:$0xff]  ;;  %v3056_v29 = vld [vmem:[%s3933_s0 + $0x40] sm:$0xff]  ;;  %v2282_v35 = vld [vmem:[%s3407_s21 + $0x30] sm:$0xf0] }
  0x16   : > { %1615 = vmatpush.bf16.msra.mxu1 %v3061_v9  ;;  %v3065_v26 = vld [vmem:[%s3933_s0 + $0x88] sm:$0xff]  ;;  %v3064_v30 = vld [vmem:[%s3933_s0 + $0x80] sm:$0xff]  ;;  %v3151_v37 = vld [vmem:[%s3407_s21 + $0x34] sm:$0xf0] }
  0x17   : > { %1664 = vmatpush.bf16.msra.mxu2 %v3069_v10  ;;  %v3073_v27 = vld [vmem:[%s3933_s0 + $0xc8] sm:$0xff]  ;;  %v3072_v31 = vld [vmem:[%s3933_s0 + $0xc0] sm:$0xff]  ;;  %v2290_v39 = vld [vmem:[%s3407_s21 + $0x38] sm:$0xf0] }
  0x18   : > { %1713 = vmatpush.bf16.msra.mxu3 %v3077_v11  ;;  %v2280_v32 = vld [vmem:[%s3407_s21] sm:$0xf]  ;;  %v3144_v34 = vld [vmem:[%s3407_s21 + $0x4] sm:$0xf]  ;;  %v2288_v36 = vld [vmem:[%s3407_s21 + $0x8] sm:$0xf] }
  0x19   : > { %1567 = vmatpush.bf16.msra.mxu0 %v3052_v12  ;;  %v3145_v38 = vld [vmem:[%s3407_s21 + $0xc] sm:$0xf]  ;;  %v3103_v40 = vld [vmem:[%s3933_s0 + $0x1b8] sm:$0xff]  ;;  %v2281_v42 = vor.u32 %v3150_v33, %v2280_v32  ;;  %v2285_v43 = vor.u32 %v3144_v34, %v2282_v35  ;;  %v2289_v44 = vor.u32 %v3151_v37, %v2288_v36  ;;  %v3102_v48 = vld [vmem:[%s3933_s0 + $0x1b0] sm:$0xff] }
  0x1a   : > { %1616 = vmatpush.bf16.msra.mxu1 %v3060_v13  ;;  %v3087_v41 = vld [vmem:[%s3933_s0 + $0x138] sm:$0xff]  ;;  %v2293_v45 = vor.u32 %v3145_v38, %v2290_v39  ;;  %v3086_v49 = vld [vmem:[%s3933_s0 + $0x130] sm:$0xff]  ;;  %v3101_v52 = vld [vmem:[%s3933_s0 + $0x1a8] sm:$0xff] }
  0x1b   : > { %1665 = vmatpush.bf16.msra.mxu2 %v3068_v14  ;;  %v3111_v46 = vld [vmem:[%s3933_s0 + $0x1f8] sm:$0xff]  ;;  %v3110_v50 = vld [vmem:[%s3933_s0 + $0x1f0] sm:$0xff]  ;;  %v3085_v53 = vld [vmem:[%s3933_s0 + $0x128] sm:$0xff] }
  0x1c   : > { %1714 = vmatpush.bf16.msra.mxu3 %v3076_v15  ;;  %v3095_v47 = vld [vmem:[%s3933_s0 + $0x178] sm:$0xff]  ;;  %v3094_v51 = vld [vmem:[%s3933_s0 + $0x170] sm:$0xff]  ;;  %v3109_v54 = vld [vmem:[%s3933_s0 + $0x1e8] sm:$0xff] }
  0x1d   : > { %1568 = vmatpush.bf16.msra.mxu0 %v3051_v16  ;;  %v3093_v55 = vld [vmem:[%s3933_s0 + $0x168] sm:$0xff]  ;;  %v2328_v56 = vld [vmem:[%s3407_s21 + $0x60] sm:$0xf]  ;;  %v3162_v57 = vld [vmem:[%s3407_s21 + $0x8c] sm:$0xf0] }
  0x1e   : > { %1617 = vmatpush.bf16.msra.mxu1 %v3059_v17  ;;  %v3156_v58 = vld [vmem:[%s3407_s21 + $0x64] sm:$0xf]  ;;  %v2330_v59 = vld [vmem:[%s3407_s21 + $0x90] sm:$0xf0]  ;;  %v2336_v60 = vld [vmem:[%s3407_s21 + $0x68] sm:$0xf]  ;;  %v2329_v0 = vor.u32 %v3162_v57, %v2328_v56 }
  0x1f   : > { %1666 = vmatpush.bf16.msra.mxu2 %v3067_v18  ;;  %v3163_v61 = vld [vmem:[%s3407_s21 + $0x94] sm:$0xf0]  ;;  %v3157_v62 = vld [vmem:[%s3407_s21 + $0x6c] sm:$0xf]  ;;  %v2338_v63 = vld [vmem:[%s3407_s21 + $0x98] sm:$0xf0]  ;;  %v2333_v1 = vor.u32 %v3156_v58, %v2330_v59 }
  0x20   : > { %1715 = vmatpush.bf16.msra.mxu3 %v3075_v19  ;;  %v2337_v2 = vor.u32 %v3163_v61, %v2336_v60  ;;  %v2341_v3 = vor.u32 %v3157_v62, %v2338_v63  ;;  %v3100_v4 = vld [vmem:[%s3933_s0 + $0x1a0] sm:$0xff]  ;;  %v3174_v9 = vld [vmem:[%s3407_s21 + $0xec] sm:$0xf0]  ;;  %v2378_v11 = vld [vmem:[%s3407_s21 + $0xf0] sm:$0xf0] }
  0x21   : > { %1569 = vmatpush.bf16.msra.mxu0 %v3050_v20  ;;  %v3084_v5 = vld [vmem:[%s3933_s0 + $0x120] sm:$0xff]  ;;  %v2384_v12 = vld [vmem:[%s3407_s21 + $0xc8] sm:$0xf]  ;;  %v3175_v13 = vld [vmem:[%s3407_s21 + $0xf4] sm:$0xf0] }
  0x22   : > { %1618 = vmatpush.bf16.msra.mxu1 %v3058_v21  ;;  %v3108_v6 = vld [vmem:[%s3933_s0 + $0x1e0] sm:$0xff]  ;;  %v3169_v14 = vld [vmem:[%s3407_s21 + $0xcc] sm:$0xf]  ;;  %v2386_v15 = vld [vmem:[%s3407_s21 + $0xf8] sm:$0xf0]  ;;  %v2385_v18 = vor.u32 %v3175_v13, %v2384_v12 }
  0x23   : > { %1667 = vmatpush.bf16.msra.mxu2 %v3066_v22  ;;  %v3092_v7 = vld [vmem:[%s3933_s0 + $0x160] sm:$0xff]  ;;  %v2389_v19 = vor.u32 %v3169_v14, %v2386_v15  ;;  %v3099_v20 = vld [vmem:[%s3933_s0 + $0x198] sm:$0xff]  ;;  %v3098_v36 = vld [vmem:[%s3933_s0 + $0x190] sm:$0xff] }
  0x24   : > { %1716 = vmatpush.bf16.msra.mxu3 %v3074_v23  ;;  %v2376_v8 = vld [vmem:[%s3407_s21 + $0xc0] sm:$0xf]  ;;  %v3168_v10 = vld [vmem:[%s3407_s21 + $0xc4] sm:$0xf]  ;;  %v3083_v21 = vld [vmem:[%s3933_s0 + $0x118] sm:$0xff] }
  0x25   : > { %1570 = vmatpush.bf16.msra.mxu0 %v3049_v24  ;;  %v2377_v16 = vor.u32 %v3174_v9, %v2376_v8  ;;  %v2381_v17 = vor.u32 %v3168_v10, %v2378_v11  ;;  %v3107_v22 = vld [vmem:[%s3933_s0 + $0x1d8] sm:$0xff]  ;;  %v2424_v24 = vld [vmem:[%s3407_s21 + $0x120] sm:$0xf]  ;;  %v3082_v37 = vld [vmem:[%s3933_s0 + $0x110] sm:$0xff] }
  0x26   : > { %1619 = vmatpush.bf16.msra.mxu1 %v3057_v25  ;;  %v3091_v23 = vld [vmem:[%s3933_s0 + $0x158] sm:$0xff]  ;;  %v3186_v25 = vld [vmem:[%s3407_s21 + $0x14c] sm:$0xf0]  ;;  %v2520_v56 = vld [vmem:[%s3407_s21 + $0x1e0] sm:$0xf] }
  0x27   : > { %1668 = vmatpush.bf16.msra.mxu2 %v3065_v26  ;;  %v3180_v26 = vld [vmem:[%s3407_s21 + $0x124] sm:$0xf]  ;;  %v2425_v32 = vor.u32 %v3186_v25, %v2424_v24  ;;  %v3106_v38 = vld [vmem:[%s3933_s0 + $0x1d0] sm:$0xff]  ;;  %v2528_v60 = vld [vmem:[%s3407_s21 + $0x1e8] sm:$0xf] }
  0x28   : > { %1717 = vmatpush.bf16.msra.mxu3 %v3073_v27  ;;  %v2426_v27 = vld [vmem:[%s3407_s21 + $0x150] sm:$0xf0]  ;;  %v3210_v57 = vld [vmem:[%s3407_s21 + $0x20c] sm:$0xf0]  ;;  %v3204_v58 = vld [vmem:[%s3407_s21 + $0x1e4] sm:$0xf] }
  0x29   : > { %1571 = vmatpush.bf16.msra.mxu0 %v3048_v28  ;;  %v2432_v28 = vld [vmem:[%s3407_s21 + $0x128] sm:$0xf]  ;;  %v2429_v33 = vor.u32 %v3180_v26, %v2426_v27  ;;  %v3090_v39 = vld [vmem:[%s3933_s0 + $0x150] sm:$0xff]  ;;  %v3211_v61 = vld [vmem:[%s3407_s21 + $0x214] sm:$0xf0] }
  0x2a   : > { %1620 = vmatpush.bf16.msra.mxu1 %v3056_v29  ;;  %v3187_v29 = vld [vmem:[%s3407_s21 + $0x154] sm:$0xf0]  ;;  %v2522_v59 = vld [vmem:[%s3407_s21 + $0x210] sm:$0xf0]  ;;  %v3205_v62 = vld [vmem:[%s3407_s21 + $0x1ec] sm:$0xf] }
  0x2b   : > { %1669 = vmatpush.bf16.msra.mxu2 %v3064_v30  ;;  %v3181_v30 = vld [vmem:[%s3407_s21 + $0x12c] sm:$0xf]  ;;  %v2433_v34 = vor.u32 %v3187_v29, %v2432_v28  ;;  %v2530_v63 = vld [vmem:[%s3407_s21 + $0x218] sm:$0xf0]  ;;  %v2568_v8 = vld [vmem:[%s3407_s21 + $0x240] sm:$0xf] }
  0x2c   : > { %1718 = vmatpush.bf16.msra.mxu3 %v3072_v31  ;;  %1572 = vmatmul.bf16.vlgmr.msra.gmra.mxu0 %v2281_v42  ;;  %v2434_v31 = vld [vmem:[%s3407_s21 + $0x158] sm:$0xf0]  ;;  %v3192_v42 = vld [vmem:[%s3407_s21 + $0x184] sm:$0xf]  ;;  %v3222_v9 = vld [vmem:[%s3407_s21 + $0x26c] sm:$0xf0] }
  0x2d   : > { %1760 = vmatpush.bf16.msrb.mxu0 %v3087_v41  ;;  %1621 = vmatmul.bf16.vlgmr.msra.gmra.mxu1 %v2285_v43  ;;  %v2437_v35 = vor.u32 %v3181_v30, %v2434_v31  ;;  %v3198_v41 = vld [vmem:[%s3407_s21 + $0x1ac] sm:$0xf0]  ;;  %v2474_v43 = vld [vmem:[%s3407_s21 + $0x1b0] sm:$0xf0]  ;;  %v3216_v10 = vld [vmem:[%s3407_s21 + $0x244] sm:$0xf] }
  0x2e   : > { %1670 = vmatmul.bf16.vlgmr.msra.gmra.mxu2 %v2289_v44  ;;  %1809 = vmatpush.bf16.msrb.mxu1 %v3095_v47  ;;  %v2480_v44 = vld [vmem:[%s3407_s21 + $0x188] sm:$0xf]  ;;  %v2482_v47 = vld [vmem:[%s3407_s21 + $0x1b8] sm:$0xf0]  ;;  %v2570_v11 = vld [vmem:[%s3407_s21 + $0x270] sm:$0xf0] }
  0x2f   : > { %1858 = vmatpush.bf16.msrb.mxu2 %v3103_v40  ;;  %1719 = vmatmul.bf16.vlgmr.msra.gmra.mxu3 %v2293_v45  ;;  %v2472_v40 = vld [vmem:[%s3407_s21 + $0x180] sm:$0xf]  ;;  %v3199_v45 = vld [vmem:[%s3407_s21 + $0x1b4] sm:$0xf0]  ;;  %v2576_v12 = vld [vmem:[%s3407_s21 + $0x248] sm:$0xf] }
  0x30   : > { %1907 = vmatpush.bf16.msrb.mxu3 %v3111_v46  ;;  %v3193_v46 = vld [vmem:[%s3407_s21 + $0x18c] sm:$0xf]  ;;  %v3223_v13 = vld [vmem:[%s3407_s21 + $0x274] sm:$0xf0]  ;;  %v2578_v15 = vld [vmem:[%s3407_s21 + $0x278] sm:$0xf0] }
  0x31   : > { %1761 = vmatpush.bf16.msrb.mxu0 %v3086_v49  ;;  %v2477_v49 = vor.u32 %v3192_v42, %v2474_v43  ;;  %v3217_v14 = vld [vmem:[%s3407_s21 + $0x24c] sm:$0xf]  ;;  %v2616_v24 = vld [vmem:[%s3407_s21 + $0x2a0] sm:$0xf]  ;;  %v3234_v25 = vld [vmem:[%s3407_s21 + $0x2cc] sm:$0xf0] }
  0x32   : > { %1810 = vmatpush.bf16.msrb.mxu1 %v3094_v51  ;;  %v2485_v51 = vor.u32 %v3193_v46, %v2482_v47  ;;  %v3228_v26 = vld [vmem:[%s3407_s21 + $0x2a4] sm:$0xf]  ;;  %v2618_v27 = vld [vmem:[%s3407_s21 + $0x2d0] sm:$0xf0]  ;;  %v2624_v28 = vld [vmem:[%s3407_s21 + $0x2a8] sm:$0xf] }
  0x33   : > { %1859 = vmatpush.bf16.msrb.mxu2 %v3102_v48  ;;  %v2473_v48 = vor.u32 %v3198_v41, %v2472_v40  ;;  %v3235_v29 = vld [vmem:[%s3407_s21 + $0x2d4] sm:$0xf0]  ;;  %v3229_v30 = vld [vmem:[%s3407_s21 + $0x2ac] sm:$0xf]  ;;  %v2626_v31 = vld [vmem:[%s3407_s21 + $0x2d8] sm:$0xf0] }
  0x34   : > { %1908 = vmatpush.bf16.msrb.mxu3 %v3110_v50  ;;  %v2481_v50 = vor.u32 %v3199_v45, %v2480_v44  ;;  %v2296_v40 = vld [vmem:[%s3407_s21 + $0x10] sm:$0xf]  ;;  %v3152_v41 = vld [vmem:[%s3407_s21 + $0x3c] sm:$0xf0]  ;;  %v3146_v42 = vld [vmem:[%s3407_s21 + $0x14] sm:$0xf] }
  0x35   : > { %1762 = vmatpush.bf16.msrb.mxu0 %v3085_v53  ;;  %v3081_v53 = vld [vmem:[%s3933_s0 + $0x108] sm:$0xff]  ;;  %v2298_v43 = vld [vmem:[%s3407_s21 + $0x40] sm:$0xf0]  ;;  %v2304_v44 = vld [vmem:[%s3407_s21 + $0x18] sm:$0xf] }
  0x36   : > { %1811 = vmatpush.bf16.msrb.mxu1 %v3093_v55  ;;  %v3089_v55 = vld [vmem:[%s3933_s0 + $0x148] sm:$0xff]  ;;  %v3147_v46 = vld [vmem:[%s3407_s21 + $0x1c] sm:$0xf] }
  0x37   : > { %1860 = vmatpush.bf16.msrb.mxu2 %v3101_v52  ;;  %v3097_v52 = vld [vmem:[%s3933_s0 + $0x188] sm:$0xff] }
  0x38   : > { %1909 = vmatpush.bf16.msrb.mxu3 %v3109_v54  ;;  %v3105_v54 = vld [vmem:[%s3933_s0 + $0x1c8] sm:$0xff] }
  0x39   : > { %1763 = vmatpush.bf16.msrb.mxu0 %v3084_v5  ;;  %v3080_v5 = vld [vmem:[%s3933_s0 + $0x100] sm:$0xff]  ;;  %v3153_v45 = vld [vmem:[%s3407_s21 + $0x44] sm:$0xf0]  ;;  %v2306_v47 = vld [vmem:[%s3407_s21 + $0x48] sm:$0xf0] }
  0x3a   : > { %1812 = vmatpush.bf16.msrb.mxu1 %v3092_v7  ;;  %v3088_v7 = vld [vmem:[%s3933_s0 + $0x140] sm:$0xff] }
  0x3b   : > { %1861 = vmatpush.bf16.msrb.mxu2 %v3100_v4  ;;  %v3096_v4 = vld [vmem:[%s3933_s0 + $0x180] sm:$0xff] }
  0x3c   : > { %1577 = vmatmul.bf16.gmra.mxu0 %v2329_v0  ;;  %1910 = vmatpush.bf16.msrb.mxu3 %v3108_v6  ;;  %v2521_v0 = vor.u32 %v3210_v57, %v2520_v56  ;;  %v3104_v6 = vld [vmem:[%s3933_s0 + $0x1c0] sm:$0xff]  ;;  %v3117_v56 = vld [vmem:[%s3933_s0 + $0x228] sm:$0xff] }
  0x3d   : > { %1626 = vmatmul.bf16.gmra.mxu1 %v2333_v1  ;;  %1764 = vmatpush.bf16.msrb.mxu0 %v3083_v21  ;;  %v2525_v1 = vor.u32 %v3204_v58, %v2522_v59  ;;  %v3119_v21 = vld [vmem:[%s3933_s0 + $0x238] sm:$0xff]  ;;  %v3141_v57 = vld [vmem:[%s3933_s0 + $0x2e8] sm:$0xff] }
  0x3e   : > { %1675 = vmatmul.bf16.gmra.mxu2 %v2337_v2  ;;  %1813 = vmatpush.bf16.msrb.mxu1 %v3091_v23  ;;  %v2529_v2 = vor.u32 %v3211_v61, %v2528_v60  ;;  %v3127_v23 = vld [vmem:[%s3933_s0 + $0x278] sm:$0xff] }
  0x3f   : > { %1724 = vmatmul.bf16.gmra.mxu3 %v2341_v3  ;;  %1862 = vmatpush.bf16.msrb.mxu2 %v3099_v20  ;;  %v2533_v3 = vor.u32 %v3205_v62, %v2530_v63  ;;  %v3135_v20 = vld [vmem:[%s3933_s0 + $0x2b8] sm:$0xff] }
  0x40   : > { %1911 = vmatpush.bf16.msrb.mxu3 %v3107_v22  ;;  %v3143_v22 = vld [vmem:[%s3933_s0 + $0x2f8] sm:$0xff] }
  0x41   : > { %1765 = vmatpush.bf16.msrb.mxu0 %v3082_v37  ;;  %v3118_v37 = vld [vmem:[%s3933_s0 + $0x230] sm:$0xff] }
  0x42   : > { %1814 = vmatpush.bf16.msrb.mxu1 %v3090_v39  ;;  %v3126_v39 = vld [vmem:[%s3933_s0 + $0x270] sm:$0xff] }
  0x43   : > { %1863 = vmatpush.bf16.msrb.mxu2 %v3098_v36  ;;  %v3134_v36 = vld [vmem:[%s3933_s0 + $0x2b0] sm:$0xff] }
  0x44   : > { %1912 = vmatpush.bf16.msrb.mxu3 %v3106_v38  ;;  %v3142_v38 = vld [vmem:[%s3933_s0 + $0x2f0] sm:$0xff] }
  0x45   : > { %1766 = vmatpush.bf16.msrb.mxu0 %v3081_v53  ;;  %v2309_v53 = vor.u32 %v3147_v46, %v2306_v47 }
  0x46   : > { %1815 = vmatpush.bf16.msrb.mxu1 %v3089_v55  ;;  %v3133_v55 = vld [vmem:[%s3933_s0 + $0x2a8] sm:$0xff] }
  0x47   : > { %1864 = vmatpush.bf16.msrb.mxu2 %v3097_v52  ;;  %v2305_v52 = vor.u32 %v3153_v45, %v2304_v44 }
  0x48   : > { %1913 = vmatpush.bf16.msrb.mxu3 %v3105_v54 }
  0x49   : > { %1767 = vmatpush.bf16.msrb.mxu0 %v3080_v5  ;;  %v2346_v5 = vld [vmem:[%s3407_s21 + $0xa0] sm:$0xf0] }
  0x4a   : > { %1816 = vmatpush.bf16.msrb.mxu1 %v3088_v7  ;;  %v3165_v7 = vld [vmem:[%s3407_s21 + $0xa4] sm:$0xf0] }
  0x4b   : > { %1865 = vmatpush.bf16.msrb.mxu2 %v3096_v4  ;;  %v3158_v4 = vld [vmem:[%s3407_s21 + $0x74] sm:$0xf] }
  0x4c   : > { %1582 = vmatmul.bf16.gmra.mxu0 %v2377_v16  ;;  %1914 = vmatpush.bf16.msrb.mxu3 %v3104_v6  ;;  %v2569_v16 = vor.u32 %v3222_v9, %v2568_v8  ;;  %v2352_v6 = vld [vmem:[%s3407_s21 + $0x78] sm:$0xf]  ;;  %v3159_v8 = vld [vmem:[%s3407_s21 + $0x7c] sm:$0xf]  ;;  %v2354_v9 = vld [vmem:[%s3407_s21 + $0xa8] sm:$0xf0] }
  0x4d   : > { %1631 = vmatmul.bf16.gmra.mxu1 %v2381_v17  ;;  %v2573_v17 = vor.u32 %v3216_v10, %v2570_v11  ;;  %1956 = vmatpush.bf16.msra.mxu0 %v3119_v21  ;;  %v3132_v21 = vld [vmem:[%s3933_s0 + $0x2a0] sm:$0xff] }
  0x4e   : > { %1680 = vmatmul.bf16.gmra.mxu2 %v2385_v18  ;;  %v2577_v18 = vor.u32 %v3223_v13, %v2576_v12  ;;  %2005 = vmatpush.bf16.msra.mxu1 %v3127_v23  ;;  %v2349_v13 = vor.u32 %v3158_v4, %v2346_v5  ;;  %v3140_v23 = vld [vmem:[%s3933_s0 + $0x2e0] sm:$0xff]  ;;  %v3189_v4 = vld [vmem:[%s3407_s21 + $0x164] sm:$0xf0]  ;;  %v3183_v5 = vld [vmem:[%s3407_s21 + $0x13c] sm:$0xf] }
  0x4f   : > { %1729 = vmatmul.bf16.gmra.mxu3 %v2389_v19  ;;  %v2581_v19 = vor.u32 %v3217_v14, %v2578_v15  ;;  %2054 = vmatpush.bf16.msra.mxu2 %v3135_v20 }
  0x50   : > { %2103 = vmatpush.bf16.msra.mxu3 %v3143_v22  ;;  %v3116_v22 = vld [vmem:[%s3933_s0 + $0x220] sm:$0xff] }
  0x51   : > { %1957 = vmatpush.bf16.msra.mxu0 %v3118_v37  ;;  %v3177_v37 = vld [vmem:[%s3407_s21 + $0x104] sm:$0xf0] }
  0x52   : > { %2006 = vmatpush.bf16.msra.mxu1 %v3126_v39  ;;  %v2402_v39 = vld [vmem:[%s3407_s21 + $0x108] sm:$0xf0] }
  0x53   : > { %2055 = vmatpush.bf16.msra.mxu2 %v3134_v36  ;;  %v2400_v36 = vld [vmem:[%s3407_s21 + $0xd8] sm:$0xf] }
  0x54   : > { %2104 = vmatpush.bf16.msra.mxu3 %v3142_v38  ;;  %v3171_v38 = vld [vmem:[%s3407_s21 + $0xdc] sm:$0xf]  ;;  %v2401_v47 = vor.u32 %v3177_v37, %v2400_v36  ;;  %v3201_v36 = vld [vmem:[%s3407_s21 + $0x1c4] sm:$0xf0] }
  0x55   : > { %1958 = vmatpush.bf16.msra.mxu0 %v3117_v56  ;;  %v3195_v37 = vld [vmem:[%s3407_s21 + $0x19c] sm:$0xf] }
  0x57   : > { %2056 = vmatpush.bf16.msra.mxu2 %v3133_v55 }
  0x58   : > { %2105 = vmatpush.bf16.msra.mxu3 %v3141_v57 }
  0x59   : > { %1959 = vmatpush.bf16.msra.mxu0 %v3116_v22 }
  0x5b   : > { %2057 = vmatpush.bf16.msra.mxu2 %v3132_v21  ;;  %v3138_v21 = vld [vmem:[%s3933_s0 + $0x2d0] sm:$0xff] }
  0x5c   : > { %1587 = vmatmul.bf16.gmra.mxu0 %v2425_v32  ;;  %v2617_v32 = vor.u32 %v3234_v25, %v2616_v24  ;;  %2106 = vmatpush.bf16.msra.mxu3 %v3140_v23 }
  0x5d   : > { %1636 = vmatmul.bf16.gmra.mxu1 %v2429_v33  ;;  %v2621_v33 = vor.u32 %v3228_v26, %v2618_v27 }
  0x5e   : > { %1685 = vmatmul.bf16.gmra.mxu2 %v2433_v34  ;;  %v2625_v34 = vor.u32 %v3235_v29, %v2624_v28 }
  0x5f   : > { %1734 = vmatmul.bf16.gmra.mxu3 %v2437_v35  ;;  %v2629_v35 = vor.u32 %v3229_v30, %v2626_v31  ;;  %v3124_v31 = vld [vmem:[%s3933_s0 + $0x260] sm:$0xff] }
  0x6c   : > { %1592 = vmatmul.bf16.gmra.mxu0 %v2473_v48  ;;  %v2297_v48 = vor.u32 %v3152_v41, %v2296_v40 }
  0x6d   : > { %1641 = vmatmul.bf16.gmra.mxu1 %v2477_v49  ;;  %v2301_v49 = vor.u32 %v3146_v42, %v2298_v43 }
  0x6e   : > { %1690 = vmatmul.bf16.gmra.mxu2 %v2481_v50 }
  0x6f   : > { %1739 = vmatmul.bf16.gmra.mxu3 %v2485_v51 }
  0x7c   : > { %1597 = vmatmul.bf16.gmra.mxu0 %v2521_v0 }
  0x7d   : > { %1646 = vmatmul.bf16.gmra.mxu1 %v2525_v1  ;;  %v3125_v1 = vld [vmem:[%s3933_s0 + $0x268] sm:$0xff] }
  0x7e   : > { %1695 = vmatmul.bf16.gmra.mxu2 %v2529_v2  ;;  %v2344_v2 = vld [vmem:[%s3407_s21 + $0x70] sm:$0xf]  ;;  %2007 = vmatpush.bf16.msra.mxu1 %v3125_v1  ;;  %v3182_v1 = vld [vmem:[%s3407_s21 + $0x134] sm:$0xf] }
  0x7f   : > { %1744 = vmatmul.bf16.gmra.mxu3 %v2533_v3  ;;  %v3164_v3 = vld [vmem:[%s3407_s21 + $0x9c] sm:$0xf0] }
  0x80   : > { %v2345_v12 = vor.u32 %v3164_v3, %v2344_v2  ;;  %v2442_v2 = vld [vmem:[%s3407_s21 + $0x160] sm:$0xf0]  ;;  %v2448_v3 = vld [vmem:[%s3407_s21 + $0x138] sm:$0xf] }
  0x82   : > { %2008 = vmatpush.bf16.msra.mxu1 %v3124_v31  ;;  %v2488_v31 = vld [vmem:[%s3407_s21 + $0x190] sm:$0xf] }
  0x8c   : > { %1602 = vmatmul.bf16.gmra.mxu0 %v2569_v16 }
  0x8d   : > { %1651 = vmatmul.bf16.gmra.mxu1 %v2573_v17  ;;  %v2353_v17 = vor.u32 %v3165_v7, %v2352_v6  ;;  %v2450_v6 = vld [vmem:[%s3407_s21 + $0x168] sm:$0xf0] }
  0x8e   : > { %1700 = vmatmul.bf16.gmra.mxu2 %v2577_v18  ;;  %v2357_v18 = vor.u32 %v3159_v8, %v2354_v9 }
  0x8f   : > { %1749 = vmatmul.bf16.gmra.mxu3 %v2581_v19 }
  0x9c   : > { %1607 = vmatmul.bf16.gmra.mxu0 %v2617_v32  ;;  %v2392_v32 = vld [vmem:[%s3407_s21 + $0xd0] sm:$0xf] }
  0x9d   : > { %1656 = vmatmul.bf16.gmra.mxu1 %v2621_v33  ;;  %v3176_v33 = vld [vmem:[%s3407_s21 + $0xfc] sm:$0xf0] }
  0x9e   : > { %1705 = vmatmul.bf16.gmra.mxu2 %v2625_v34  ;;  %v3170_v34 = vld [vmem:[%s3407_s21 + $0xd4] sm:$0xf]  ;;  %v2393_v42 = vor.u32 %v3176_v33, %v2392_v32  ;;  %v3200_v32 = vld [vmem:[%s3407_s21 + $0x1bc] sm:$0xf0] }
  0x9f   : > { %1754 = vmatmul.bf16.gmra.mxu3 %v2629_v35  ;;  %v2394_v35 = vld [vmem:[%s3407_s21 + $0x100] sm:$0xf0]  ;;  %v3194_v33 = vld [vmem:[%s3407_s21 + $0x194] sm:$0xf] }
  0xa0   : > { %v2397_v43 = vor.u32 %v3170_v34, %v2394_v35  ;;  %v2490_v34 = vld [vmem:[%s3407_s21 + $0x1c0] sm:$0xf0]  ;;  %v2496_v35 = vld [vmem:[%s3407_s21 + $0x198] sm:$0xf] }
  0xa9   : > { %v1573_v50 = vpop.f32.mrf.mxu0 }
  0xaa   : > { %v1622_v51 = vpop.f32.mrf.mxu1 }
  0xab   : > { %v1623_v54 = vadd.f32 %v1622_v51, %v1573_v50  ;;  %v3131_v51 = vld [vmem:[%s3933_s0 + $0x298] sm:$0xff] }
  0xac   : > { %1768 = vmatmul.bf16.vlgmr.msrb.gmra.mxu0 %v2297_v48  ;;  %v2405_v48 = vor.u32 %v3171_v38, %v2402_v39  ;;  %2058 = vmatpush.bf16.msra.mxu2 %v3131_v51  ;;  %v2498_v38 = vld [vmem:[%s3407_s21 + $0x1c8] sm:$0xf0] }
  0xad   : > { %1817 = vmatmul.bf16.vlgmr.msrb.gmra.mxu1 %v2301_v49  ;;  %v3129_v51 = vld [vmem:[%s3933_s0 + $0x288] sm:$0xff] }
  0xae   : > { %1866 = vmatmul.bf16.vlgmr.msrb.gmra.mxu2 %v2305_v52  ;;  %v3115_v52 = vld [vmem:[%s3933_s0 + $0x218] sm:$0xff] }
  0xaf   : > { %1915 = vmatmul.bf16.vlgmr.msrb.gmra.mxu3 %v2309_v53  ;;  %v3139_v53 = vld [vmem:[%s3933_s0 + $0x2d8] sm:$0xff]  ;;  %1960 = vmatpush.bf16.msra.mxu0 %v3115_v52  ;;  %v3113_v52 = vld [vmem:[%s3933_s0 + $0x208] sm:$0xff] }
  0xb0   : > { %2107 = vmatpush.bf16.msra.mxu3 %v3139_v53  ;;  %v3137_v53 = vld [vmem:[%s3933_s0 + $0x2c8] sm:$0xff] }
  0xb1   : > { %v1671_v58 = vpop.f32.mrf.mxu2  ;;  %v1575_v61 = vpop.f32.mrf.mxu0 }
  0xb2   : > { %v1720_v59 = vpop.f32.mrf.mxu3  ;;  %v1672_v60 = vadd.f32 %v1671_v58, %v1623_v54  ;;  %v1624_v62 = vpop.f32.mrf.mxu1 }
  0xb3   : > { %v1625_v63 = vadd.f32 %v1624_v62, %v1575_v61  ;;  %v3123_v61 = vld [vmem:[%s3933_s0 + $0x258] sm:$0xff]  ;;  %v2440_v62 = vld [vmem:[%s3407_s21 + $0x130] sm:$0xf] }
  0xb4   : > { %v3628_v0 = vadd.f32 %v1720_v59, %v1672_v60  ;;  %2009 = vmatpush.bf16.msra.mxu1 %v3123_v61  ;;  %2108 = vmatpush.bf16.msra.mxu3 %v3138_v21  ;;  %v3128_v21 = vld [vmem:[%s3933_s0 + $0x280] sm:$0xff] }
  0xb8   : > { %2109 = vmatpush.bf16.msra.mxu3 %v3137_v53 }
  0xb9   : > { %v1673_v10 = vpop.f32.mrf.mxu2  ;;  %v1578_v15 = vpop.f32.mrf.mxu0 }
  0xba   : > { %v1722_v11 = vpop.f32.mrf.mxu3  ;;  %v1674_v14 = vadd.f32 %v1673_v10, %v1625_v63  ;;  %v1627_v16 = vpop.f32.mrf.mxu1  ;;  %v3188_v63 = vld [vmem:[%s3407_s21 + $0x15c] sm:$0xf0]  ;;  %v2445_v10 = vor.u32 %v3182_v1, %v2442_v2  ;;  %v3206_v2 = vld [vmem:[%s3407_s21 + $0x1f4] sm:$0xf] }
  0xbb   : > { %v1628_v19 = vadd.f32 %v1627_v16, %v1578_v15  ;;  %v2441_v9 = vor.u32 %v3188_v63, %v2440_v62  ;;  %v2453_v15 = vor.u32 %v3183_v5, %v2450_v6  ;;  %v3121_v62 = vld [vmem:[%s3933_s0 + $0x248] sm:$0xff]  ;;  %v2536_v63 = vld [vmem:[%s3407_s21 + $0x1f0] sm:$0xf]  ;;  %v3212_v1 = vld [vmem:[%s3407_s21 + $0x21c] sm:$0xf0] }
  0xbc   : > { %v3641_v20 = vadd.f32 %v1722_v11, %v1674_v14  ;;  %1773 = vmatmul.bf16.gmra.mxu0 %v2345_v12  ;;  %v2449_v14 = vor.u32 %v3189_v4, %v2448_v3  ;;  %v2538_v3 = vld [vmem:[%s3407_s21 + $0x220] sm:$0xf0]  ;;  %v2544_v4 = vld [vmem:[%s3407_s21 + $0x1f8] sm:$0xf]  ;;  %v3213_v5 = vld [vmem:[%s3407_s21 + $0x224] sm:$0xf0] }
  0xbd   : > { %1822 = vmatmul.bf16.gmra.mxu1 %v2349_v13  ;;  %v3207_v6 = vld [vmem:[%s3407_s21 + $0x1fc] sm:$0xf] }
  0xbe   : > { %1871 = vmatmul.bf16.gmra.mxu2 %v2353_v17 }
  0xbf   : > { %1920 = vmatmul.bf16.gmra.mxu3 %v2357_v18  ;;  %v3130_v18 = vld [vmem:[%s3933_s0 + $0x290] sm:$0xff] }
  0xc0   : > { %2059 = vmatpush.bf16.msra.mxu2 %v3130_v18 }
  0xc1   : > { %v1676_v24 = vpop.f32.mrf.mxu2  ;;  %v1580_v27 = vpop.f32.mrf.mxu0 }
  0xc2   : > { %v1725_v25 = vpop.f32.mrf.mxu3  ;;  %v1677_v26 = vadd.f32 %v1676_v24, %v1628_v19  ;;  %v1629_v28 = vpop.f32.mrf.mxu1  ;;  %v3114_v19 = vld [vmem:[%s3933_s0 + $0x210] sm:$0xff] }
  0xc3   : > { %v1630_v29 = vadd.f32 %v1629_v28, %v1580_v27  ;;  %1961 = vmatpush.bf16.msra.mxu0 %v3114_v19 }
  0xc4   : > { %v3652_v30 = vadd.f32 %v1725_v25, %v1677_v26  ;;  %2060 = vmatpush.bf16.msra.mxu2 %v3129_v51 }
  0xc7   : > { %1962 = vmatpush.bf16.msra.mxu0 %v3113_v52 }
  0xc8   : > { %2061 = vmatpush.bf16.msra.mxu2 %v3128_v21 }
  0xc9   : > { %v1678_v40 = vpop.f32.mrf.mxu2  ;;  %v1583_v45 = vpop.f32.mrf.mxu0 }
  0xca   : > { %v1727_v41 = vpop.f32.mrf.mxu3  ;;  %v1679_v44 = vadd.f32 %v1678_v40, %v1630_v29  ;;  %v1632_v46 = vpop.f32.mrf.mxu1  ;;  %v3122_v29 = vld [vmem:[%s3933_s0 + $0x250] sm:$0xff] }
  0xcb   : > { %v1633_v49 = vadd.f32 %v1632_v46, %v1583_v45  ;;  %2010 = vmatpush.bf16.msra.mxu1 %v3122_v29  ;;  %v2497_v46 = vor.u32 %v3201_v36, %v2496_v35  ;;  %v3224_v35 = vld [vmem:[%s3407_s21 + $0x27c] sm:$0xf0]  ;;  %v3218_v36 = vld [vmem:[%s3407_s21 + $0x254] sm:$0xf] }
  0xcc   : > { %v3665_v50 = vadd.f32 %v1727_v41, %v1679_v44  ;;  %1778 = vmatmul.bf16.gmra.mxu0 %v2393_v42  ;;  %v2489_v41 = vor.u32 %v3200_v32, %v2488_v31  ;;  %v2493_v42 = vor.u32 %v3194_v33, %v2490_v34  ;;  %v3120_v33 = vld [vmem:[%s3933_s0 + $0x240] sm:$0xff]  ;;  %v2584_v34 = vld [vmem:[%s3407_s21 + $0x250] sm:$0xf] }
  0xcd   : > { %1827 = vmatmul.bf16.gmra.mxu1 %v2397_v43 }
  0xce   : > { %1876 = vmatmul.bf16.gmra.mxu2 %v2401_v47  ;;  %v2501_v47 = vor.u32 %v3195_v37, %v2498_v38  ;;  %v2586_v37 = vld [vmem:[%s3407_s21 + $0x280] sm:$0xf0]  ;;  %v2592_v38 = vld [vmem:[%s3407_s21 + $0x258] sm:$0xf] }
  0xcf   : > { %1925 = vmatmul.bf16.gmra.mxu3 %v2405_v48  ;;  %2011 = vmatpush.bf16.msra.mxu1 %v3121_v62 }
  0xd1   : > { %v1681_v54 = vpop.f32.mrf.mxu2  ;;  %v1585_v57 = vpop.f32.mrf.mxu0 }
  0xd2   : > { %v1730_v55 = vpop.f32.mrf.mxu3  ;;  %v1682_v56 = vadd.f32 %v1681_v54, %v1633_v49  ;;  %v1634_v58 = vpop.f32.mrf.mxu1 }
  0xd3   : > { %v1635_v59 = vadd.f32 %v1634_v58, %v1585_v57  ;;  %2012 = vmatpush.bf16.msra.mxu1 %v3120_v33  ;;  %v2312_v33 = vld [vmem:[%s3407_s21 + $0x20] sm:$0xf] }
  0xd4   : > { %v3676_v60 = vadd.f32 %v1730_v55, %v1682_v56 }
  0xd9   : > { %v1683_v7 = vpop.f32.mrf.mxu2  ;;  %v1588_v12 = vpop.f32.mrf.mxu0 }
  0xda   : > { %v1732_v8 = vpop.f32.mrf.mxu3  ;;  %v1684_v11 = vadd.f32 %v1683_v7, %v1635_v59  ;;  %v1637_v13 = vpop.f32.mrf.mxu1  ;;  %v2546_v7 = vld [vmem:[%s3407_s21 + $0x228] sm:$0xf0] }
  0xdb   : > { %v1638_v16 = vadd.f32 %v1637_v13, %v1588_v12 }
  0xdc   : > { %v3689_v17 = vadd.f32 %v1732_v8, %v1684_v11  ;;  %1783 = vmatmul.bf16.gmra.mxu0 %v2441_v9  ;;  %v2541_v11 = vor.u32 %v3206_v2, %v2538_v3  ;;  %v3236_v2 = vld [vmem:[%s3407_s21 + $0x2dc] sm:$0xf0]  ;;  %v3230_v3 = vld [vmem:[%s3407_s21 + $0x2b4] sm:$0xf] }
  0xdd   : > { %1832 = vmatmul.bf16.gmra.mxu1 %v2445_v10  ;;  %v2537_v10 = vor.u32 %v3212_v1, %v2536_v63  ;;  %v2632_v1 = vld [vmem:[%s3407_s21 + $0x2b0] sm:$0xf] }
  0xde   : > { %1881 = vmatmul.bf16.gmra.mxu2 %v2449_v14 }
  0xdf   : > { %1930 = vmatmul.bf16.gmra.mxu3 %v2453_v15  ;;  %v2545_v15 = vor.u32 %v3213_v5, %v2544_v4  ;;  %v2634_v4 = vld [vmem:[%s3407_s21 + $0x2e0] sm:$0xf0]  ;;  %v2640_v5 = vld [vmem:[%s3407_s21 + $0x2b8] sm:$0xf] }
  0xe1   : > { %v1686_v22 = vpop.f32.mrf.mxu2  ;;  %v1590_v25 = vpop.f32.mrf.mxu0 }
  0xe2   : > { %v1735_v23 = vpop.f32.mrf.mxu3  ;;  %v1687_v24 = vadd.f32 %v1686_v22, %v1638_v16  ;;  %v1639_v26 = vpop.f32.mrf.mxu1  ;;  %v2549_v16 = vor.u32 %v3207_v6, %v2546_v7  ;;  %v3112_v22 = vld [vmem:[%s3933_s0 + $0x200] sm:$0xff]  ;;  %v3237_v6 = vld [vmem:[%s3407_s21 + $0x2e4] sm:$0xf0]  ;;  %v3231_v7 = vld [vmem:[%s3407_s21 + $0x2bc] sm:$0xf] }
  0xe3   : > { %v1640_v27 = vadd.f32 %v1639_v26, %v1590_v25  ;;  %1963 = vmatpush.bf16.msra.mxu0 %v3112_v22 }
  0xe4   : > { %v3700_v28 = vadd.f32 %v1735_v23, %v1687_v24  ;;  %v3136_v23 = vld [vmem:[%s3933_s0 + $0x2c0] sm:$0xff] }
  0xe5   : > { %2110 = vmatpush.bf16.msra.mxu3 %v3136_v23 }
  0xe9   : > { %v1688_v39 = vpop.f32.mrf.mxu2  ;;  %v1593_v44 = vpop.f32.mrf.mxu0 }
  0xea   : > { %v1737_v40 = vpop.f32.mrf.mxu3  ;;  %v1689_v43 = vadd.f32 %v1688_v39, %v1640_v27  ;;  %v1642_v45 = vpop.f32.mrf.mxu1  ;;  %v3225_v39 = vld [vmem:[%s3407_s21 + $0x284] sm:$0xf0] }
  0xeb   : > { %v1643_v48 = vadd.f32 %v1642_v45, %v1593_v44  ;;  %v2585_v44 = vor.u32 %v3224_v35, %v2584_v34  ;;  %v2589_v45 = vor.u32 %v3218_v36, %v2586_v37  ;;  %v2593_v51 = vor.u32 %v3225_v39, %v2592_v38  ;;  %v3154_v34 = vld [vmem:[%s3407_s21 + $0x4c] sm:$0xf0]  ;;  %v3148_v35 = vld [vmem:[%s3407_s21 + $0x24] sm:$0xf]  ;;  %v2314_v36 = vld [vmem:[%s3407_s21 + $0x50] sm:$0xf0] }
  0xec   : > { %v3713_v49 = vadd.f32 %v1737_v40, %v1689_v43  ;;  %1788 = vmatmul.bf16.gmra.mxu0 %v2489_v41  ;;  %v3219_v40 = vld [vmem:[%s3407_s21 + $0x25c] sm:$0xf]  ;;  %v2594_v41 = vld [vmem:[%s3407_s21 + $0x288] sm:$0xf0]  ;;  %v2320_v37 = vld [vmem:[%s3407_s21 + $0x28] sm:$0xf] }
  0xed   : > { %1837 = vmatmul.bf16.gmra.mxu1 %v2493_v42  ;;  %v2597_v52 = vor.u32 %v3219_v40, %v2594_v41  ;;  %v3155_v38 = vld [vmem:[%s3407_s21 + $0x54] sm:$0xf0]  ;;  %v3149_v39 = vld [vmem:[%s3407_s21 + $0x2c] sm:$0xf]  ;;  %v2322_v40 = vld [vmem:[%s3407_s21 + $0x58] sm:$0xf0] }
  0xee   : > { %1886 = vmatmul.bf16.gmra.mxu2 %v2497_v46 }
  0xef   : > { %1935 = vmatmul.bf16.gmra.mxu3 %v2501_v47 }
  0xf1   : > { %v1691_v54 = vpop.f32.mrf.mxu2  ;;  %v1595_v57 = vpop.f32.mrf.mxu0 }
  0xf2   : > { %v1740_v55 = vpop.f32.mrf.mxu3  ;;  %v1692_v56 = vadd.f32 %v1691_v54, %v1643_v48  ;;  %v1644_v58 = vpop.f32.mrf.mxu1 }
  0xf3   : > { %v1645_v59 = vadd.f32 %v1644_v58, %v1595_v57 }
  0xf4   : > { %v3724_v61 = vadd.f32 %v1740_v55, %v1692_v56 }
  0xf9   : > { %v1693_v8 = vpop.f32.mrf.mxu2  ;;  %v1598_v13 = vpop.f32.mrf.mxu0 }
  0xfa   : > { %v1742_v9 = vpop.f32.mrf.mxu3  ;;  %v1694_v12 = vadd.f32 %v1693_v8, %v1645_v59  ;;  %v1647_v14 = vpop.f32.mrf.mxu1  ;;  %v2642_v8 = vld [vmem:[%s3407_s21 + $0x2e8] sm:$0xf0] }
  0xfb   : > { %v1648_v18 = vadd.f32 %v1647_v14, %v1598_v13 }
  0xfc   : > { %v3737_v19 = vadd.f32 %v1742_v9, %v1694_v12  ;;  %1793 = vmatmul.bf16.gmra.mxu0 %v2537_v10  ;;  %v2637_v12 = vor.u32 %v3230_v3, %v2634_v4  ;;  %v2360_v3 = vld [vmem:[%s3407_s21 + $0x80] sm:$0xf]  ;;  %v3166_v4 = vld [vmem:[%s3407_s21 + $0xac] sm:$0xf0] }
  0xfd   : > { %1842 = vmatmul.bf16.gmra.mxu1 %v2541_v11  ;;  %v2633_v11 = vor.u32 %v3236_v2, %v2632_v1 }
  0xfe   : > { %1891 = vmatmul.bf16.gmra.mxu2 %v2545_v15 }
  0xff   : > { %1940 = vmatmul.bf16.gmra.mxu3 %v2549_v16  ;;  %v2641_v16 = vor.u32 %v3237_v6, %v2640_v5  ;;  %v3160_v5 = vld [vmem:[%s3407_s21 + $0x84] sm:$0xf]  ;;  %v2362_v6 = vld [vmem:[%s3407_s21 + $0xb0] sm:$0xf0] }
 0x101   : > { %v1696_v24 = vpop.f32.mrf.mxu2  ;;  %v1600_v27 = vpop.f32.mrf.mxu0 }
 0x102   : > { %v1745_v25 = vpop.f32.mrf.mxu3  ;;  %v1697_v26 = vadd.f32 %v1696_v24, %v1648_v18  ;;  %v1649_v29 = vpop.f32.mrf.mxu1  ;;  %v2645_v18 = vor.u32 %v3231_v7, %v2642_v8  ;;  %v2368_v7 = vld [vmem:[%s3407_s21 + $0x88] sm:$0xf]  ;;  %v3167_v8 = vld [vmem:[%s3407_s21 + $0xb4] sm:$0xf0] }
 0x103   : > { %v1650_v31 = vadd.f32 %v1649_v29, %v1600_v27 }
 0x104   : > { %v3748_v32 = vadd.f32 %v1745_v25, %v1697_v26 }
 0x109   : > { %v1698_v42 = vpop.f32.mrf.mxu2  ;;  %v1603_v47 = vpop.f32.mrf.mxu0 }
 0x10a   : > { %v1747_v43 = vpop.f32.mrf.mxu3  ;;  %v1699_v46 = vadd.f32 %v1698_v42, %v1650_v31  ;;  %v1652_v48 = vpop.f32.mrf.mxu1 }
 0x10b   : > { %v1653_v53 = vadd.f32 %v1652_v48, %v1603_v47  ;;  %v2321_v48 = vor.u32 %v3155_v38, %v2320_v37  ;;  %v2408_v37 = vld [vmem:[%s3407_s21 + $0xe0] sm:$0xf]  ;;  %v3178_v38 = vld [vmem:[%s3407_s21 + $0x10c] sm:$0xf0] }
 0x10c   : > { %v3761_v54 = vadd.f32 %v1747_v43, %v1699_v46  ;;  %1798 = vmatmul.bf16.gmra.mxu0 %v2585_v44  ;;  %v2313_v43 = vor.u32 %v3154_v34, %v2312_v33  ;;  %v2317_v44 = vor.u32 %v3148_v35, %v2314_v36 }
 0x10d   : > { %1847 = vmatmul.bf16.gmra.mxu1 %v2589_v45 }
 0x10e   : > { %1896 = vmatmul.bf16.gmra.mxu2 %v2593_v51  ;;  %v2325_v51 = vor.u32 %v3149_v39, %v2322_v40  ;;  %v3172_v39 = vld [vmem:[%s3407_s21 + $0xe4] sm:$0xf]  ;;  %v2410_v40 = vld [vmem:[%s3407_s21 + $0x110] sm:$0xf0] }
 0x10f   : > { %1945 = vmatmul.bf16.gmra.mxu3 %v2597_v52 }
 0x111   : > { %v1701_v55 = vpop.f32.mrf.mxu2  ;;  %v1605_v58 = vpop.f32.mrf.mxu0 }
 0x112   : > { %v1750_v56 = vpop.f32.mrf.mxu3  ;;  %v1702_v57 = vadd.f32 %v1701_v55, %v1653_v53  ;;  %v1654_v59 = vpop.f32.mrf.mxu1 }
 0x113   : > { %v1655_v62 = vadd.f32 %v1654_v59, %v1605_v58 }
 0x114   : > { %v3763_v63 = vadd.f32 %v1750_v56, %v1702_v57 }
 0x119   : > { %v1703_v9 = vpop.f32.mrf.mxu2  ;;  %v1608_v14 = vpop.f32.mrf.mxu0 }
 0x11a   : > { %v1752_v10 = vpop.f32.mrf.mxu3  ;;  %v1704_v13 = vadd.f32 %v1703_v9, %v1655_v62  ;;  %v1657_v15 = vpop.f32.mrf.mxu1  ;;  %v3161_v9 = vld [vmem:[%s3407_s21 + $0x8c] sm:$0xf] }
 0x11b   : > { %v1658_v21 = vadd.f32 %v1657_v15, %v1608_v14  ;;  %v2365_v14 = vor.u32 %v3160_v5, %v2362_v6 }
 0x11c   : > { %v3773_v22 = vadd.f32 %v1752_v10, %v1704_v13  ;;  %1803 = vmatmul.bf16.gmra.mxu0 %v2633_v11  ;;  %v2370_v10 = vld [vmem:[%s3407_s21 + $0xb8] sm:$0xf0]  ;;  %v2361_v13 = vor.u32 %v3166_v4, %v2360_v3 }
 0x11d   : > { %1852 = vmatmul.bf16.gmra.mxu1 %v2637_v12 }
 0x11e   : > { %1901 = vmatmul.bf16.gmra.mxu2 %v2641_v16 }
 0x11f   : > { %1950 = vmatmul.bf16.gmra.mxu3 %v2645_v18 }
 0x121   : > { %v1706_v23 = vpop.f32.mrf.mxu2  ;;  %v1610_v26 = vpop.f32.mrf.mxu0 }
 0x122   : > { %v1755_v24 = vpop.f32.mrf.mxu3  ;;  %v1707_v25 = vadd.f32 %v1706_v23, %v1658_v21  ;;  %v1659_v27 = vpop.f32.mrf.mxu1  ;;  %v2369_v21 = vor.u32 %v3167_v8, %v2368_v7  ;;  %v2456_v7 = vld [vmem:[%s3407_s21 + $0x140] sm:$0xf]  ;;  %v3190_v8 = vld [vmem:[%s3407_s21 + $0x16c] sm:$0xf0] }
 0x123   : > { %v1660_v29 = vadd.f32 %v1659_v27, %v1610_v26 }
 0x124   : > { %v3775_v31 = vadd.f32 %v1755_v24, %v1707_v25 }
 0x129   : > { %v1708_v41 = vpop.f32.mrf.mxu2  ;;  %v1769_v46 = vpop.f32.mrf.mxu0 }
 0x12a   : > { %v1757_v42 = vpop.f32.mrf.mxu3  ;;  %v1709_v45 = vadd.f32 %v1708_v41, %v1660_v29  ;;  %v1818_v47 = vpop.f32.mrf.mxu1  ;;  %v1770_v52 = vadd.f32 %v1769_v46, %v3628_v0  ;;  %v2416_v41 = vld [vmem:[%s3407_s21 + $0xe8] sm:$0xf] }
 0x12c   : > { %v3786_v53 = vadd.f32 %v1757_v42, %v1709_v45  ;;  %v1819_v55 = vadd.f32 %v1818_v47, %v1770_v52  ;;  %1964 = vmatmul.bf16.vlgmr.msra.gmra.mxu0 %v2313_v43  ;;  %v3179_v42 = vld [vmem:[%s3407_s21 + $0x114] sm:$0xf0]  ;;  %v3173_v43 = vld [vmem:[%s3407_s21 + $0xec] sm:$0xf]  ;;  %v2409_v47 = vor.u32 %v3178_v38, %v2408_v37 }
 0x12d   : > { %2013 = vmatmul.bf16.vlgmr.msra.gmra.mxu1 %v2317_v44  ;;  %v2418_v44 = vld [vmem:[%s3407_s21 + $0x118] sm:$0xf0] }
 0x12e   : > { %2062 = vmatmul.bf16.vlgmr.msra.gmra.mxu2 %v2321_v48  ;;  %v2413_v48 = vor.u32 %v3172_v39, %v2410_v40 }
 0x12f   : > { %2111 = vmatmul.bf16.vlgmr.msra.gmra.mxu3 %v2325_v51 }
 0x131   : > { %v1867_v56 = vpop.f32.mrf.mxu2  ;;  %v1771_v59 = vpop.f32.mrf.mxu0 }
 0x132   : > { %v1916_v57 = vpop.f32.mrf.mxu3  ;;  %v1868_v58 = vadd.f32 %v1867_v56, %v1819_v55  ;;  %v1820_v62 = vpop.f32.mrf.mxu1  ;;  %v1772_v0 = vadd.f32 %v1771_v59, %v3641_v20  ;;  %v2373_v20 = vor.u32 %v3161_v9, %v2370_v10  ;;  %v2417_v56 = vor.u32 %v3179_v42, %v2416_v41  ;;  %v3184_v9 = vld [vmem:[%s3407_s21 + $0x144] sm:$0xf]  ;;  %v2458_v10 = vld [vmem:[%s3407_s21 + $0x170] sm:$0xf0]  ;;  %v2504_v41 = vld [vmem:[%s3407_s21 + $0x1a0] sm:$0xf] }
 0x133   : > { %v3202_v42 = vld [vmem:[%s3407_s21 + $0x1cc] sm:$0xf0] }
 0x134   : > { %v3789_v1 = vadd.f32 %v1916_v57, %v1868_v58  ;;  %v1821_v2 = vadd.f32 %v1820_v62, %v1772_v0 }
 0x139   : > { %v1869_v11 = vpop.f32.mrf.mxu2  ;;  %v1774_v16 = vpop.f32.mrf.mxu0 }
 0x13a   : > { %v1918_v12 = vpop.f32.mrf.mxu3  ;;  %v1870_v15 = vadd.f32 %v1869_v11, %v1821_v2  ;;  %v1823_v18 = vpop.f32.mrf.mxu1  ;;  %v1775_v23 = vadd.f32 %v1774_v16, %v3652_v30  ;;  %v2464_v11 = vld [vmem:[%s3407_s21 + $0x148] sm:$0xf] }
 0x13c   : > { %v3800_v24 = vadd.f32 %v1918_v12, %v1870_v15  ;;  %v1824_v25 = vadd.f32 %v1823_v18, %v1775_v23  ;;  %1969 = vmatmul.bf16.gmra.mxu0 %v2361_v13  ;;  %v3191_v12 = vld [vmem:[%s3407_s21 + $0x174] sm:$0xf0]  ;;  %v3185_v13 = vld [vmem:[%s3407_s21 + $0x14c] sm:$0xf]  ;;  %v2457_v18 = vor.u32 %v3190_v8, %v2456_v7 }
 0x13d   : > { %2018 = vmatmul.bf16.gmra.mxu1 %v2365_v14  ;;  %v2466_v14 = vld [vmem:[%s3407_s21 + $0x178] sm:$0xf0] }
 0x13e   : > { %2067 = vmatmul.bf16.gmra.mxu2 %v2369_v21  ;;  %v2461_v21 = vor.u32 %v3184_v9, %v2458_v10 }
 0x13f   : > { %2116 = vmatmul.bf16.gmra.mxu3 %v2373_v20 }
 0x141   : > { %v1872_v26 = vpop.f32.mrf.mxu2  ;;  %v1776_v33 = vpop.f32.mrf.mxu0 }
 0x142   : > { %v1921_v27 = vpop.f32.mrf.mxu3  ;;  %v1873_v29 = vadd.f32 %v1872_v26, %v1824_v25  ;;  %v1825_v34 = vpop.f32.mrf.mxu1  ;;  %v1777_v30 = vadd.f32 %v1776_v33, %v3665_v50  ;;  %v2421_v50 = vor.u32 %v3173_v43, %v2418_v44  ;;  %v2465_v26 = vor.u32 %v3191_v12, %v2464_v11  ;;  %v3196_v43 = vld [vmem:[%s3407_s21 + $0x1a4] sm:$0xf]  ;;  %v2506_v44 = vld [vmem:[%s3407_s21 + $0x1d0] sm:$0xf0]  ;;  %v2552_v11 = vld [vmem:[%s3407_s21 + $0x200] sm:$0xf] }
 0x143   : > { %v3214_v12 = vld [vmem:[%s3407_s21 + $0x22c] sm:$0xf0] }
 0x144   : > { %v3803_v35 = vadd.f32 %v1921_v27, %v1873_v29  ;;  %v1826_v36 = vadd.f32 %v1825_v34, %v1777_v30 }
 0x149   : > { %v1874_v45 = vpop.f32.mrf.mxu2  ;;  %v1779_v52 = vpop.f32.mrf.mxu0 }
 0x14a   : > { %v1923_v46 = vpop.f32.mrf.mxu3  ;;  %v1875_v51 = vadd.f32 %v1874_v45, %v1826_v36  ;;  %v1828_v55 = vpop.f32.mrf.mxu1  ;;  %v1780_v57 = vadd.f32 %v1779_v52, %v3676_v60  ;;  %v2512_v45 = vld [vmem:[%s3407_s21 + $0x1a8] sm:$0xf] }
 0x14c   : > { %v3814_v58 = vadd.f32 %v1923_v46, %v1875_v51  ;;  %v1829_v59 = vadd.f32 %v1828_v55, %v1780_v57  ;;  %1974 = vmatmul.bf16.gmra.mxu0 %v2409_v47  ;;  %v3203_v46 = vld [vmem:[%s3407_s21 + $0x1d4] sm:$0xf0]  ;;  %v3197_v47 = vld [vmem:[%s3407_s21 + $0x1ac] sm:$0xf]  ;;  %v2505_v55 = vor.u32 %v3202_v42, %v2504_v41 }
 0x14d   : > { %2023 = vmatmul.bf16.gmra.mxu1 %v2413_v48  ;;  %v2514_v48 = vld [vmem:[%s3407_s21 + $0x1d8] sm:$0xf0] }
 0x14e   : > { %2072 = vmatmul.bf16.gmra.mxu2 %v2417_v56  ;;  %v2509_v56 = vor.u32 %v3196_v43, %v2506_v44 }
 0x14f   : > { %2121 = vmatmul.bf16.gmra.mxu3 %v2421_v50 }
 0x151   : > { %v1877_v62 = vpop.f32.mrf.mxu2  ;;  %v1781_v3 = vpop.f32.mrf.mxu0 }
 0x152   : > { %v1926_v0 = vpop.f32.mrf.mxu3  ;;  %v1878_v2 = vadd.f32 %v1877_v62, %v1829_v59  ;;  %v1830_v4 = vpop.f32.mrf.mxu1  ;;  %v1782_v60 = vadd.f32 %v1781_v3, %v3689_v17  ;;  %v2469_v17 = vor.u32 %v3185_v13, %v2466_v14  ;;  %v2513_v62 = vor.u32 %v3203_v46, %v2512_v45  ;;  %v3208_v13 = vld [vmem:[%s3407_s21 + $0x204] sm:$0xf]  ;;  %v2554_v14 = vld [vmem:[%s3407_s21 + $0x230] sm:$0xf0]  ;;  %v2600_v45 = vld [vmem:[%s3407_s21 + $0x260] sm:$0xf] }
 0x153   : > { %v3226_v46 = vld [vmem:[%s3407_s21 + $0x28c] sm:$0xf0] }
 0x154   : > { %v3817_v5 = vadd.f32 %v1926_v0, %v1878_v2  ;;  %v1831_v6 = vadd.f32 %v1830_v4, %v1782_v60 }
 0x159   : > { %v1879_v15 = vpop.f32.mrf.mxu2  ;;  %v1784_v23 = vpop.f32.mrf.mxu0 }
 0x15a   : > { %v1928_v16 = vpop.f32.mrf.mxu3  ;;  %v1880_v20 = vadd.f32 %v1879_v15, %v1831_v6  ;;  %v1833_v25 = vpop.f32.mrf.mxu1  ;;  %v1785_v27 = vadd.f32 %v1784_v23, %v3700_v28  ;;  %v2560_v15 = vld [vmem:[%s3407_s21 + $0x208] sm:$0xf] }
 0x15c   : > { %v3828_v29 = vadd.f32 %v1928_v16, %v1880_v20  ;;  %v1834_v33 = vadd.f32 %v1833_v25, %v1785_v27  ;;  %1979 = vmatmul.bf16.gmra.mxu0 %v2457_v18  ;;  %v3215_v16 = vld [vmem:[%s3407_s21 + $0x234] sm:$0xf0]  ;;  %v3209_v18 = vld [vmem:[%s3407_s21 + $0x20c] sm:$0xf]  ;;  %v2553_v25 = vor.u32 %v3214_v12, %v2552_v11 }
 0x15d   : > { %2028 = vmatmul.bf16.gmra.mxu1 %v2461_v21  ;;  %v2562_v21 = vld [vmem:[%s3407_s21 + $0x238] sm:$0xf0] }
 0x15e   : > { %2077 = vmatmul.bf16.gmra.mxu2 %v2465_v26  ;;  %v2557_v26 = vor.u32 %v3208_v13, %v2554_v14 }
 0x15f   : > { %2126 = vmatmul.bf16.gmra.mxu3 %v2469_v17 }
 0x161   : > { %v1882_v34 = vpop.f32.mrf.mxu2  ;;  %v1786_v37 = vpop.f32.mrf.mxu0 }
 0x162   : > { %v1931_v30 = vpop.f32.mrf.mxu3  ;;  %v1883_v36 = vadd.f32 %v1882_v34, %v1834_v33  ;;  %v1835_v38 = vpop.f32.mrf.mxu1  ;;  %v1787_v28 = vadd.f32 %v1786_v37, %v3713_v49  ;;  %v2517_v49 = vor.u32 %v3197_v47, %v2514_v48  ;;  %v2561_v34 = vor.u32 %v3215_v16, %v2560_v15  ;;  %v3220_v47 = vld [vmem:[%s3407_s21 + $0x264] sm:$0xf]  ;;  %v2602_v48 = vld [vmem:[%s3407_s21 + $0x290] sm:$0xf0]  ;;  %v2648_v15 = vld [vmem:[%s3407_s21 + $0x2c0] sm:$0xf] }
 0x163   : > { %v3238_v16 = vld [vmem:[%s3407_s21 + $0x2ec] sm:$0xf0] }
 0x164   : > { %v3831_v39 = vadd.f32 %v1931_v30, %v1883_v36  ;;  %v1836_v40 = vadd.f32 %v1835_v38, %v1787_v28 }
 0x169   : > { %v1884_v51 = vpop.f32.mrf.mxu2  ;;  %v1789_v57 = vpop.f32.mrf.mxu0 }
 0x16a   : > { %v1933_v52 = vpop.f32.mrf.mxu3  ;;  %v1885_v50 = vadd.f32 %v1884_v51, %v1836_v40  ;;  %v1838_v59 = vpop.f32.mrf.mxu1  ;;  %v1790_v0 = vadd.f32 %v1789_v57, %v3724_v61  ;;  %v2608_v51 = vld [vmem:[%s3407_s21 + $0x268] sm:$0xf] }
 0x16c   : > { %v3842_v2 = vadd.f32 %v1933_v52, %v1885_v50  ;;  %v1839_v3 = vadd.f32 %v1838_v59, %v1790_v0  ;;  %1984 = vmatmul.bf16.gmra.mxu0 %v2505_v55  ;;  %v3227_v52 = vld [vmem:[%s3407_s21 + $0x294] sm:$0xf0]  ;;  %v3221_v55 = vld [vmem:[%s3407_s21 + $0x26c] sm:$0xf]  ;;  %v2601_v59 = vor.u32 %v3226_v46, %v2600_v45 }
 0x16d   : > { %2033 = vmatmul.bf16.gmra.mxu1 %v2509_v56  ;;  %v2610_v56 = vld [vmem:[%s3407_s21 + $0x298] sm:$0xf0] }
 0x16e   : > { %2082 = vmatmul.bf16.gmra.mxu2 %v2513_v62  ;;  %v2605_v62 = vor.u32 %v3220_v47, %v2602_v48 }
 0x16f   : > { %2131 = vmatmul.bf16.gmra.mxu3 %v2517_v49 }
 0x171   : > { %v1887_v4 = vpop.f32.mrf.mxu2  ;;  %v1791_v7 = vpop.f32.mrf.mxu0 }
 0x172   : > { %v1936_v60 = vpop.f32.mrf.mxu3  ;;  %v1888_v6 = vadd.f32 %v1887_v4, %v1839_v3  ;;  %v1840_v8 = vpop.f32.mrf.mxu1  ;;  %v1792_v61 = vadd.f32 %v1791_v7, %v3737_v19  ;;  %v2565_v19 = vor.u32 %v3209_v18, %v2562_v21  ;;  %v2609_v4 = vor.u32 %v3227_v52, %v2608_v51  ;;  %v3232_v18 = vld [vmem:[%s3407_s21 + $0x2c4] sm:$0xf]  ;;  %v2650_v21 = vld [vmem:[%s3407_s21 + $0x2f0] sm:$0xf0] }
 0x174   : > { %v3845_v9 = vadd.f32 %v1936_v60, %v1888_v6  ;;  %v1841_v10 = vadd.f32 %v1840_v8, %v1792_v61 }
 0x179   : > { %v1889_v20 = vpop.f32.mrf.mxu2  ;;  %v1794_v27 = vpop.f32.mrf.mxu0 }
 0x17a   : > { %v1938_v23 = vpop.f32.mrf.mxu3  ;;  %v1890_v17 = vadd.f32 %v1889_v20, %v1841_v10  ;;  %v1843_v33 = vpop.f32.mrf.mxu1  ;;  %v1795_v30 = vadd.f32 %v1794_v27, %v3748_v32  ;;  %v2656_v20 = vld [vmem:[%s3407_s21 + $0x2c8] sm:$0xf] }
 0x17c   : > { %v3856_v36 = vadd.f32 %v1938_v23, %v1890_v17  ;;  %v1844_v37 = vadd.f32 %v1843_v33, %v1795_v30  ;;  %1989 = vmatmul.bf16.gmra.mxu0 %v2553_v25  ;;  %v3239_v23 = vld [vmem:[%s3407_s21 + $0x2f4] sm:$0xf0]  ;;  %v3233_v25 = vld [vmem:[%s3407_s21 + $0x2cc] sm:$0xf]  ;;  %v2649_v33 = vor.u32 %v3238_v16, %v2648_v15 }
 0x17d   : > { %2038 = vmatmul.bf16.gmra.mxu1 %v2557_v26  ;;  %v2658_v26 = vld [vmem:[%s3407_s21 + $0x2f8] sm:$0xf0]  ;;  %s2277_s21 = sshll.u32 %s3943_s9, 3 }
 0x17e   : > { %2087 = vmatmul.bf16.gmra.mxu2 %v2561_v34  ;;  %v2653_v34 = vor.u32 %v3232_v18, %v2650_v21  ;;  %s214_s26 = scalar_lea.vmem %s3935_s2, %s2277_s21 }
 0x17f   : > { %2136 = vmatmul.bf16.gmra.mxu3 %v2565_v19 }
 0x181   : > { %v1892_v38 = vpop.f32.mrf.mxu2  ;;  %v1796_v41 = vpop.f32.mrf.mxu0 }
 0x182   : > { %v1941_v28 = vpop.f32.mrf.mxu3  ;;  %v1893_v40 = vadd.f32 %v1892_v38, %v1844_v37  ;;  %v1845_v42 = vpop.f32.mrf.mxu1  ;;  %v1797_v32 = vadd.f32 %v1796_v41, %v3761_v54  ;;  %v2613_v54 = vor.u32 %v3221_v55, %v2610_v56  ;;  %v2657_v38 = vor.u32 %v3239_v23, %v2656_v20 }
 0x184   : > { %v3859_v43 = vadd.f32 %v1941_v28, %v1893_v40  ;;  %v1846_v44 = vadd.f32 %v1845_v42, %v1797_v32 }
 0x189   : > { %v1894_v50 = vpop.f32.mrf.mxu2  ;;  %v1799_v0 = vpop.f32.mrf.mxu0 }
 0x18a   : > { %v1943_v57 = vpop.f32.mrf.mxu3  ;;  %v1895_v49 = vadd.f32 %v1894_v50, %v1846_v44  ;;  %v1848_v3 = vpop.f32.mrf.mxu1  ;;  %v1800_v60 = vadd.f32 %v1799_v0, %v3763_v63 }
 0x18c   : > { %v3870_v6 = vadd.f32 %v1943_v57, %v1895_v49  ;;  %v1849_v7 = vadd.f32 %v1848_v3, %v1800_v60  ;;  %1994 = vmatmul.bf16.gmra.mxu0 %v2601_v59 }
 0x18d   : > { %2043 = vmatmul.bf16.gmra.mxu1 %v2605_v62 }
 0x18e   : > { %2092 = vmatmul.bf16.gmra.mxu2 %v2609_v4 }
 0x18f   : > { %2141 = vmatmul.bf16.gmra.mxu3 %v2613_v54 }
 0x191   : > { %v1897_v8 = vpop.f32.mrf.mxu2  ;;  %v1801_v11 = vpop.f32.mrf.mxu0 }
 0x192   : > { %v1946_v61 = vpop.f32.mrf.mxu3  ;;  %v1898_v10 = vadd.f32 %v1897_v8, %v1849_v7  ;;  %v1850_v12 = vpop.f32.mrf.mxu1  ;;  %v1802_v63 = vadd.f32 %v1801_v11, %v3773_v22  ;;  %v2661_v22 = vor.u32 %v3233_v25, %v2658_v26 }
 0x194   : > { %v3873_v13 = vadd.f32 %v1946_v61, %v1898_v10  ;;  %v1851_v14 = vadd.f32 %v1850_v12, %v1802_v63 }
 0x199   : > { %v1899_v17 = vpop.f32.mrf.mxu2  ;;  %v1804_v30 = vpop.f32.mrf.mxu0 }
 0x19a   : > { %v1948_v27 = vpop.f32.mrf.mxu3  ;;  %v1900_v19 = vadd.f32 %v1899_v17, %v1851_v14  ;;  %v1853_v37 = vpop.f32.mrf.mxu1  ;;  %v1805_v28 = vadd.f32 %v1804_v30, %v3775_v31 }
 0x19c   : > { %v3884_v40 = vadd.f32 %v1948_v27, %v1900_v19  ;;  %v1854_v41 = vadd.f32 %v1853_v37, %v1805_v28  ;;  %1999 = vmatmul.bf16.gmra.mxu0 %v2649_v33 }
 0x19d   : > { %2048 = vmatmul.bf16.gmra.mxu1 %v2653_v34 }
 0x19e   : > { %2097 = vmatmul.bf16.gmra.mxu2 %v2657_v38 }
 0x19f   : > { %2146 = vmatmul.bf16.gmra.mxu3 %v2661_v22 }
 0x1a1   : > { %v1902_v42 = vpop.f32.mrf.mxu2  ;;  %v1806_v45 = vpop.f32.mrf.mxu0 }
 0x1a2   : > { %v1951_v32 = vpop.f32.mrf.mxu3  ;;  %v1903_v44 = vadd.f32 %v1902_v42, %v1854_v41  ;;  %v1855_v46 = vpop.f32.mrf.mxu1  ;;  %v1807_v47 = vadd.f32 %v1806_v45, %v3786_v53 }
 0x1a4   : > { %v3887_v48 = vadd.f32 %v1951_v32, %v1903_v44  ;;  %v1856_v51 = vadd.f32 %v1855_v46, %v1807_v47 }
 0x1a9   : > { %v1904_v52 = vpop.f32.mrf.mxu2  ;;  %v1965_v56 = vpop.f32.mrf.mxu0 }
 0x1aa   : > { %v1953_v55 = vpop.f32.mrf.mxu3  ;;  %v1905_v31 = vadd.f32 %v1904_v52, %v1856_v51  ;;  %v2014_v50 = vpop.f32.mrf.mxu1  ;;  %v1966_v57 = vadd.f32 %v1965_v56, %v3789_v1 }
 0x1ac   : > { %v3890_v59 = vadd.f32 %v1953_v55, %v1905_v31  ;;  %v2015_v62 = vadd.f32 %v2014_v50, %v1966_v57 }
 0x1b1   : > { %v2063_v49 = vpop.f32.mrf.mxu2  ;;  %v1967_v4 = vpop.f32.mrf.mxu0 }
 0x1b2   : > { %v2112_v0 = vpop.f32.mrf.mxu3  ;;  %v2064_v3 = vadd.f32 %v2063_v49, %v2015_v62  ;;  %v2016_v54 = vpop.f32.mrf.mxu1  ;;  %v1968_v53 = vadd.f32 %v1967_v4, %v3800_v24 }
 0x1b4   : > { %v3893_v60 = vadd.f32 %v2112_v0, %v2064_v3  ;;  %v2017_v7 = vadd.f32 %v2016_v54, %v1968_v53 }
 0x1b9   : > { %v2065_v8 = vpop.f32.mrf.mxu2  ;;  %v1970_v11 = vpop.f32.mrf.mxu0 }
 0x1ba   : > { %v2114_v61 = vpop.f32.mrf.mxu3  ;;  %v2066_v10 = vadd.f32 %v2065_v8, %v2017_v7  ;;  %v2019_v12 = vpop.f32.mrf.mxu1  ;;  %v1971_v1 = vadd.f32 %v1970_v11, %v3803_v35 }
 0x1bc   : > { %v3896_v63 = vadd.f32 %v2114_v61, %v2066_v10  ;;  %v2020_v14 = vadd.f32 %v2019_v12, %v1971_v1 }
 0x1c1   : > { %v2068_v15 = vpop.f32.mrf.mxu2  ;;  %v1972_v21 = vpop.f32.mrf.mxu0 }
 0x1c2   : > { %v2117_v16 = vpop.f32.mrf.mxu3  ;;  %v2069_v18 = vadd.f32 %v2068_v15, %v2020_v14  ;;  %v2021_v20 = vpop.f32.mrf.mxu1  ;;  %v1973_v24 = vadd.f32 %v1972_v21, %v3814_v58 }
 0x1c4   : > { %v3899_v23 = vadd.f32 %v2117_v16, %v2069_v18  ;;  %v2022_v25 = vadd.f32 %v2021_v20, %v1973_v24 }
 0x1c9   : > { %v2070_v26 = vpop.f32.mrf.mxu2  ;;  %v1975_v33 = vpop.f32.mrf.mxu0 }
 0x1ca   : > { %v2119_v17 = vpop.f32.mrf.mxu3  ;;  %v2071_v27 = vadd.f32 %v2070_v26, %v2022_v25  ;;  %v2024_v34 = vpop.f32.mrf.mxu1  ;;  %v1976_v35 = vadd.f32 %v1975_v33, %v3817_v5 }
 0x1cc   : > { %v3902_v19 = vadd.f32 %v2119_v17, %v2071_v27  ;;  %v2025_v30 = vadd.f32 %v2024_v34, %v1976_v35 }
 0x1d1   : > { %v2073_v37 = vpop.f32.mrf.mxu2  ;;  %v1977_v28 = vpop.f32.mrf.mxu0 }
 0x1d2   : > { %v2122_v38 = vpop.f32.mrf.mxu3  ;;  %v2074_v22 = vadd.f32 %v2073_v37, %v2025_v30  ;;  %v2026_v41 = vpop.f32.mrf.mxu1  ;;  %v1978_v58 = vadd.f32 %v1977_v28, %v3828_v29 }
 0x1d4   : > { %v2123_v42 = vadd.f32 %v2122_v38, %v2074_v22  ;;  %v2027_v32 = vadd.f32 %v2026_v41, %v1978_v58 }
 0x1d6   : > { %v2152_v44 = vmax.f32 %v3893_v60, %v2123_v42 }
 0x1d9   : > { %v2075_v45 = vpop.f32.mrf.mxu2  ;;  %v1980_v51 = vpop.f32.mrf.mxu0 }
 0x1da   : > { %v2124_v46 = vpop.f32.mrf.mxu3  ;;  %v2076_v47 = vadd.f32 %v2075_v45, %v2027_v32  ;;  %v2029_v52 = vpop.f32.mrf.mxu1  ;;  %v1981_v5 = vadd.f32 %v1980_v51, %v3831_v39 }
 0x1dc   : > { %v2125_v55 = vadd.f32 %v2124_v46, %v2076_v47  ;;  %v2030_v31 = vadd.f32 %v2029_v52, %v1981_v5 }
 0x1de   : > { %v2153_v56 = vmax.f32 %v3896_v63, %v2125_v55 }
 0x1e1   : > { %v2078_v50 = vpop.f32.mrf.mxu2  ;;  %v1982_v49 = vpop.f32.mrf.mxu0 }
 0x1e2   : > { %v2127_v57 = vpop.f32.mrf.mxu3  ;;  %v2079_v62 = vadd.f32 %v2078_v50, %v2030_v31  ;;  %v2031_v29 = vpop.f32.mrf.mxu1  ;;  %v1983_v3 = vadd.f32 %v1982_v49, %v3842_v2 }
 0x1e4   : > { %v2128_v0 = vadd.f32 %v2127_v57, %v2079_v62  ;;  %v2032_v54 = vadd.f32 %v2031_v29, %v1983_v3 }
 0x1e6   : > { %v2154_v4 = vmax.f32 %v3899_v23, %v2128_v0 }
 0x1e9   : > { %v2080_v53 = vpop.f32.mrf.mxu2  ;;  %v1985_v8 = vpop.f32.mrf.mxu0 }
 0x1ea   : > { %v2129_v60 = vpop.f32.mrf.mxu3  ;;  %v2081_v7 = vadd.f32 %v2080_v53, %v2032_v54  ;;  %v2034_v39 = vpop.f32.mrf.mxu1  ;;  %v1986_v10 = vadd.f32 %v1985_v8, %v3845_v9 }
 0x1ec   : > { %v2130_v61 = vadd.f32 %v2129_v60, %v2081_v7  ;;  %v2035_v12 = vadd.f32 %v2034_v39, %v1986_v10 }
 0x1ee   : > { %v2155_v11 = vmax.f32 %v3902_v19, %v2130_v61 }
 0x1f1   : > { %v2083_v1 = vpop.f32.mrf.mxu2  ;;  %v1987_v15 = vpop.f32.mrf.mxu0 }
 0x1f2   : > { %v2132_v63 = vpop.f32.mrf.mxu3  ;;  %v2084_v14 = vadd.f32 %v2083_v1, %v2035_v12  ;;  %v2036_v16 = vpop.f32.mrf.mxu1  ;;  %v1988_v18 = vadd.f32 %v1987_v15, %v3856_v36 }
 0x1f4   : > { %v2133_v2 = vadd.f32 %v2132_v63, %v2084_v14  ;;  %v2037_v20 = vadd.f32 %v2036_v16, %v1988_v18 }
 0x1f6   : > { %v2156_v21 = vmax.f32 %v2152_v44, %v2133_v2 }
 0x1f9   : > { %v2085_v24 = vpop.f32.mrf.mxu2  ;;  %v1990_v26 = vpop.f32.mrf.mxu0 }
 0x1fa   : > { %v2134_v23 = vpop.f32.mrf.mxu3  ;;  %v2086_v25 = vadd.f32 %v2085_v24, %v2037_v20  ;;  %v2039_v17 = vpop.f32.mrf.mxu1  ;;  %v1991_v9 = vadd.f32 %v1990_v26, %v3859_v43 }
 0x1fc   : > { %v2135_v27 = vadd.f32 %v2134_v23, %v2086_v25  ;;  %v2040_v34 = vadd.f32 %v2039_v17, %v1991_v9 }
 0x1fe   : > { %v2157_v33 = vmax.f32 %v2153_v56, %v2135_v27 }
 0x201   : > { %v2088_v35 = vpop.f32.mrf.mxu2  ;;  %v1992_v37 = vpop.f32.mrf.mxu0 }
 0x202   : > { %v2137_v19 = vpop.f32.mrf.mxu3  ;;  %v2089_v30 = vadd.f32 %v2088_v35, %v2040_v34  ;;  %v2041_v38 = vpop.f32.mrf.mxu1  ;;  %v1993_v36 = vadd.f32 %v1992_v37, %v3870_v6 }
 0x204   : > { %v2138_v22 = vadd.f32 %v2137_v19, %v2089_v30  ;;  %v2042_v41 = vadd.f32 %v2041_v38, %v1993_v36 }
 0x206   : > { %v2158_v28 = vmax.f32 %v2154_v4, %v2138_v22 }
 0x209   : > { %v2090_v58 = vpop.f32.mrf.mxu2  ;;  %v1995_v44 = vpop.f32.mrf.mxu0 }
 0x20a   : > { %v2139_v42 = vpop.f32.mrf.mxu3  ;;  %v2091_v32 = vadd.f32 %v2090_v58, %v2042_v41  ;;  %v2044_v45 = vpop.f32.mrf.mxu1  ;;  %v1996_v43 = vadd.f32 %v1995_v44, %v3873_v13 }
 0x20c   : > { %v2140_v46 = vadd.f32 %v2139_v42, %v2091_v32  ;;  %v2045_v51 = vadd.f32 %v2044_v45, %v1996_v43 }
 0x20e   : > { %v2159_v47 = vmax.f32 %v2155_v11, %v2140_v46 }
 0x211   : > { %v2093_v52 = vpop.f32.mrf.mxu2  ;;  %v1997_v31 = vpop.f32.mrf.mxu0 }
 0x212   : > { %v2142_v5 = vpop.f32.mrf.mxu3  ;;  %v2094_v55 = vadd.f32 %v2093_v52, %v2045_v51  ;;  %v2046_v56 = vpop.f32.mrf.mxu1  ;;  %v1998_v6 = vadd.f32 %v1997_v31, %v3884_v40 }
 0x214   : > { %v2143_v50 = vadd.f32 %v2142_v5, %v2094_v55  ;;  %v2047_v62 = vadd.f32 %v2046_v56, %v1998_v6 }
 0x216   : > { %v2160_v57 = vmax.f32 %v2156_v21, %v2143_v50 }
 0x219   : > { %v2095_v49 = vpop.f32.mrf.mxu2  ;;  %v2000_v3 = vpop.f32.mrf.mxu0 }
 0x21a   : > { %v2144_v29 = vpop.f32.mrf.mxu3  ;;  %v2096_v0 = vadd.f32 %v2095_v49, %v2047_v62  ;;  %v2001_v13 = vadd.f32 %v2000_v3, %v3887_v48  ;;  %v2049_v54 = vpop.f32.mrf.mxu1 }
 0x21c   : > { %v2145_v4 = vadd.f32 %v2144_v29, %v2096_v0  ;;  %v2050_v7 = vadd.f32 %v2049_v54, %v2001_v13 }
 0x21e   : > { %v2161_v53 = vmax.f32 %v2157_v33, %v2145_v4 }
 0x220   : > { %v2164_v60 = vmax.f32 %v2160_v57, %v2161_v53 }
 0x221   : > { %v2098_v8 = vpop.f32.mrf.mxu2  ;;  %v2002_v10 = vpop.f32.mrf.mxu0 }
 0x222   : > { %v2147_v39 = vpop.f32.mrf.mxu3  ;;  %v2099_v61 = vadd.f32 %v2098_v8, %v2050_v7  ;;  %v2003_v11 = vadd.f32 %v2002_v10, %v3890_v59  ;;  %v2051_v1 = vpop.f32.mrf.mxu1 }
 0x224   : > { %v2148_v40 = vadd.f32 %v2147_v39, %v2099_v61  ;;  %v2052_v63 = vadd.f32 %v2051_v1, %v2003_v11 }
 0x226   : > { %v2162_v12 = vmax.f32 %v2158_v28, %v2148_v40 }
 0x229   : > { %v2100_v14 = vpop.f32.mrf.mxu2 }
 0x22a   : > { %v2101_v15 = vadd.f32 %v2100_v14, %v2052_v63  ;;  %v2149_v16 = vpop.f32.mrf.mxu3 }
 0x22c   : > { %v2150_v48 = vadd.f32 %v2149_v16, %v2101_v15 }
 0x22e   : > { %v2163_v2 = vmax.f32 %v2159_v47, %v2150_v48 }
 0x230   : > { %v2165_v18 = vmax.f32 %v2162_v12, %v2163_v2 }
 0x232   : > { %v2166_v21 = vmax.f32 %v2164_v60, %v2165_v18 }
 0x234   : > { %2169 = vst [vmem:[%s214_s26] sm:$0xff] %v2166_v21 }
 0x235 PF: > { %s12_s11 = sadd.s32 1, %s3288_s11   ;;  %s3936_s9 = smov %s3284_s10 }
 0x236   : > { %p9_p6 = scmp.ge.s32.totalorder %s12_s11, 4   ;;  %s3937_s10 = smov %s3939_s12 }
 0x238   :  { %11 = sbr.rel (!%p9_p6) target bundleno = 2 (0x2), region = 65 }

</bundles_post_ra>
